<compile_context>
chip_gen: v6e
topology: v6e:2x2x1
jax: 0.10.0
libtpu: 0.0.40
codegen_flags: <defaults>
</compile_context>

<pallas_src>
import functools
import math

import jax
import jax.numpy as jnp
from jax import lax
from jax.experimental import pallas as pl
from jax.experimental.pallas import tpu as pltpu


# ----------------------------------------------------------------------------
# chip-dependent sizing
# ----------------------------------------------------------------------------
def _tpu_vmem_capacity():
    try:
        return int(pltpu.get_tpu_info().vmem_capacity_bytes)
    except Exception:
        return 64 * 1024 * 1024  # conservative (v7x-sized) fallback


_VMEM_CAP = _tpu_vmem_capacity()
_SMALL_VMEM = _VMEM_CAP <= 64 * 1024 * 1024          # v7x-class
_VMEM_LIMIT = min(100 * 1024 * 1024, (_VMEM_CAP * 3) // 4)
_LN_BLOCK_M = 256 if _SMALL_VMEM else 512            # fused LN kernel row tile
_MM_BLOCK_NK = 512 if _SMALL_VMEM else 1024          # matmul K/N tiles


# ----------------------------------------------------------------------------
# helpers
# ----------------------------------------------------------------------------
def _pad_axis_to(arr, axis, mult):
    size = arr.shape[axis]
    pad = (-size) % mult
    if pad == 0:
        return arr
    widths = [(0, 0)] * arr.ndim
    widths[axis] = (0, pad)
    return jnp.pad(arr, widths)


def _choose_block(dim, target):
    # full dim for small problems (block == full array dim is always legal),
    # otherwise a large aligned tile (targets are multiples of 8 and 128).
    return dim if dim <= target else target


# ----------------------------------------------------------------------------
# Kernel 1: tiled matmul + bias (+ optional ReLU), bf16 MXU / f32 accumulate
# ----------------------------------------------------------------------------
def _matmul_bias_kernel(x_ref, w_ref, b_ref, o_ref, acc_ref, *, activation):
    k = pl.program_id(2)

    @pl.when(k == 0)
    def _():
        acc_ref[...] = jnp.zeros_like(acc_ref)

    acc_ref[...] += jnp.dot(
        x_ref[...].astype(jnp.bfloat16),
        w_ref[...].astype(jnp.bfloat16),
        preferred_element_type=jnp.float32,
    )

    @pl.when(k == pl.num_programs(2) - 1)
    def _():
        y = acc_ref[...] + b_ref[...].astype(jnp.float32)
        if activation == "relu":
            y = jnp.maximum(y, 0.0)
        o_ref[...] = y.astype(o_ref.dtype)


def matmul_bias(x, w, b, *, activation=None, block_m=512, block_n=None,
                block_k=None, out_dtype=None):
    """(M,K) @ (K,N) + b, optional ReLU. Pads to tile multiples, slices back."""
    M, K = x.shape
    K2, N = w.shape
    assert K == K2
    out_dtype = out_dtype or x.dtype
    block_n = block_n or _MM_BLOCK_NK
    block_k = block_k or _MM_BLOCK_NK

    tm = _choose_block(M, block_m)
    tn = _choose_block(N, block_n)
    tk = _choose_block(K, block_k)

    xp = _pad_axis_to(_pad_axis_to(x, 0, tm), 1, tk)
    wp = _pad_axis_to(_pad_axis_to(w, 0, tk), 1, tn)
    bp = _pad_axis_to(b.reshape(1, N), 1, tn)

    Mp, Kp = xp.shape
    Np = wp.shape[1]
    grid = (Mp // tm, Np // tn, Kp // tk)

    kernel = functools.partial(_matmul_bias_kernel, activation=activation)
    out = pl.pallas_call(
        kernel,
        out_shape=jax.ShapeDtypeStruct((Mp, Np), out_dtype),
        grid_spec=pltpu.PrefetchScalarGridSpec(
            num_scalar_prefetch=0,
            grid=grid,
            in_specs=[
                pl.BlockSpec((tm, tk), lambda i, j, k: (i, k)),
                pl.BlockSpec((tk, tn), lambda i, j, k: (k, j)),
                pl.BlockSpec((1, tn), lambda i, j, k: (0, j)),  # bias: const row
            ],
            out_specs=pl.BlockSpec((tm, tn), lambda i, j, k: (i, j)),
            scratch_shapes=[pltpu.VMEM((tm, tn), jnp.float32)],
        ),
        compiler_params=pltpu.CompilerParams(
            dimension_semantics=("parallel", "parallel", "arbitrary"),
            vmem_limit_bytes=_VMEM_LIMIT,
        ),
    )(xp, wp, bp)
    return out[:M, :N]


# ----------------------------------------------------------------------------
# Kernel 2: matmul + bias + residual add + LayerNorm (torch.var unbiased)
# ----------------------------------------------------------------------------
def _matmul_bias_res_ln_kernel(x_ref, w_ref, b_ref, res_ref, gamma_ref,
                               beta_ref, o_ref, acc_ref, *, eps, n_dim):
    k = pl.program_id(1)

    @pl.when(k == 0)
    def _():
        acc_ref[...] = jnp.zeros_like(acc_ref)

    acc_ref[...] += jnp.dot(
        x_ref[...].astype(jnp.bfloat16),
        w_ref[...].astype(jnp.bfloat16),
        preferred_element_type=jnp.float32,
    )

    @pl.when(k == pl.num_programs(1) - 1)
    def _():
        y = (acc_ref[...]
             + b_ref[...].astype(jnp.float32)
             + res_ref[...].astype(jnp.float32))
        inv_n = 1.0 / float(n_dim)                 # compile-time constants
        inv_nm1 = 1.0 / float(max(n_dim - 1, 1))   # torch.var default: /(N-1)
        mean = jnp.sum(y, axis=-1, keepdims=True) * inv_n
        diff = y - mean
        var = jnp.sum(diff * diff, axis=-1, keepdims=True) * inv_nm1
        norm = diff * lax.rsqrt(var + eps)
        out = (gamma_ref[...].astype(jnp.float32) * norm
               + beta_ref[...].astype(jnp.float32))
        o_ref[...] = out.astype(o_ref.dtype)


def matmul_bias_res_ln(x, w, b, res, gamma, beta, *, eps=1e-12,
                       block_m=None, block_k=512, out_dtype=None):
    """LayerNorm((M,K)@(K,N) + b + res) over the last axis (full N per block)."""
    M, K = x.shape
    K2, N = w.shape
    assert K == K2 and res.shape == (M, N)
    out_dtype = out_dtype or res.dtype
    block_m = block_m or _LN_BLOCK_M

    tm = _choose_block(M, block_m)
    tk = _choose_block(K, block_k)

    xp = _pad_axis_to(_pad_axis_to(x, 0, tm), 1, tk)
    wp = _pad_axis_to(w, 0, tk)
    resp = _pad_axis_to(res, 0, tm)
    b2 = b.reshape(1, N)
    g2 = gamma.reshape(1, N)
    bt2 = beta.reshape(1, N)

    Mp, Kp = xp.shape
    grid = (Mp // tm, Kp // tk)

    kernel = functools.partial(_matmul_bias_res_ln_kernel, eps=eps, n_dim=N)
    out = pl.pallas_call(
        kernel,
        out_shape=jax.ShapeDtypeStruct((Mp, N), out_dtype),
        grid_spec=pltpu.PrefetchScalarGridSpec(
            num_scalar_prefetch=0,
            grid=grid,
            in_specs=[
                pl.BlockSpec((tm, tk), lambda i, k: (i, k)),
                pl.BlockSpec((tk, N), lambda i, k: (k, 0)),
                pl.BlockSpec((1, N), lambda i, k: (0, 0)),   # bias: constant idx
                pl.BlockSpec((tm, N), lambda i, k: (i, 0)),  # residual
                pl.BlockSpec((1, N), lambda i, k: (0, 0)),   # gamma
                pl.BlockSpec((1, N), lambda i, k: (0, 0)),   # beta
            ],
            out_specs=pl.BlockSpec((tm, N), lambda i, k: (i, 0)),
            scratch_shapes=[pltpu.VMEM((tm, N), jnp.float32)],
        ),
        compiler_params=pltpu.CompilerParams(
            dimension_semantics=("parallel", "arbitrary"),
            vmem_limit_bytes=_VMEM_LIMIT,
        ),
    )(xp, wp, b2, resp, g2, bt2)
    return out[:M]


# ----------------------------------------------------------------------------
# Kernel 3: attention directly on the fused QKV buffer, one batch per step.
# Reads (S, 3*H*dh) and writes the head-concatenated (S, H*dh) block, so no
# XLA split / transpose / concat is needed around it.
# ----------------------------------------------------------------------------
def _attention_kernel(qkv_ref, o_ref, *, num_heads, d_head, scale):
    H, dh = num_heads, d_head
    qkv = qkv_ref[...]                       # (S, 3*H*dh)
    # Static per-head loop; H is a small compile-time constant.
    for h in range(H):
        q = qkv[:, h * dh:(h + 1) * dh].astype(jnp.bfloat16)
        k = qkv[:, (H + h) * dh:(H + h + 1) * dh].astype(jnp.bfloat16)
        v = qkv[:, (2 * H + h) * dh:(2 * H + h + 1) * dh].astype(jnp.bfloat16)
        # contract dh-vs-dh: no materialized K transpose (MXU-native).
        s = lax.dot_general(q, k, (((1,), (1,)), ((), ())),
                            preferred_element_type=jnp.float32) * scale
        m = jnp.max(s, axis=-1, keepdims=True)
        p = jnp.exp(s - m)                   # f32 softmax math (v5e-safe)
        denom = jnp.sum(p, axis=-1, keepdims=True)
        o = jnp.dot(p.astype(jnp.bfloat16), v,
                    preferred_element_type=jnp.float32)
        o = o * pl.reciprocal(denom, approx=True)   # divide -> EUP slot
        o_ref[:, h * dh:(h + 1) * dh] = o.astype(o_ref.dtype)


def attention(qkv, *, batch, seq, num_heads, d_head, scale, out_dtype=None):
    """qkv: (B*S, 3*H*dh) -> (B*S, H*dh) in head-concat (torch.cat) layout."""
    rows, width = qkv.shape
    assert rows == batch * seq and width == 3 * num_heads * d_head
    # row block of size `seq` must be sublane-legal
    assert (seq % 8 == 0) or (batch == 1), "seq must be a multiple of 8"
    out_dtype = out_dtype or qkv.dtype
    kernel = functools.partial(_attention_kernel, num_heads=num_heads,
                               d_head=d_head, scale=scale)
    return pl.pallas_call(
        kernel,
        out_shape=jax.ShapeDtypeStruct((rows, num_heads * d_head), out_dtype),
        grid_spec=pltpu.PrefetchScalarGridSpec(
            num_scalar_prefetch=0,
            grid=(batch,),   # parallel axis; even batch balances v7x's 2 TCs
            in_specs=[
                pl.BlockSpec((seq, width), lambda b: (b, 0)),
            ],
            out_specs=pl.BlockSpec((seq, num_heads * d_head), lambda b: (b, 0)),
        ),
        compiler_params=pltpu.CompilerParams(
            dimension_semantics=("parallel",),
            vmem_limit_bytes=_VMEM_LIMIT,
        ),
    )(qkv)


# ----------------------------------------------------------------------------
# EncoderBlock forward (Pallas)
# ----------------------------------------------------------------------------
@functools.partial(jax.jit, static_argnames=("num_heads", "eps"))
def encoder_block(x, params, num_heads, eps=1e-12):
    B, S, E = x.shape
    H = num_heads
    assert E % H == 0
    dh = E // H
    rows = B * S
    scale = 1.0 / math.sqrt(dh)

    x2 = x.reshape(rows, E)

    # pre-cast weights once: bf16 MXU operands + halved weight HBM traffic.
    bf16 = jnp.bfloat16
    w_qkv = params["w_qkv"].astype(bf16)
    w_o = params["w_o"].astype(bf16)
    w1 = params["w1"].astype(bf16)
    w2 = params["w2"].astype(bf16)

    # fused QKV projection for all heads: (rows, E) @ (E, 3*H*dh) + b
    qkv = matmul_bias(x2, w_qkv, params["b_qkv"], out_dtype=bf16)

    # attention reads the fused qkv buffer directly and emits head-concat layout
    attn2 = attention(qkv, batch=B, seq=S, num_heads=H, d_head=dh,
                      scale=scale, out_dtype=bf16)

    # attention output projection + residual(x) + LayerNorm1, fused
    out1 = matmul_bias_res_ln(attn2, w_o, params["b_o"], x2,
                              params["gamma1"], params["beta1"], eps=eps,
                              out_dtype=jnp.float32)

    # dropout -> identity (inference)

    # feedforward: linear1 + ReLU (bf16 intermediate)
    hidden = matmul_bias(out1, w1, params["b1"], activation="relu",
                         out_dtype=bf16)

    # linear2 + residual(out1) + LayerNorm2, fused
    out2 = matmul_bias_res_ln(hidden, w2, params["b2"], out1,
                              params["gamma2"], params["beta2"], eps=eps,
                              out_dtype=x.dtype)

    # dropout -> identity (inference)
    return out2.reshape(B, S, E)


# ----------------------------------------------------------------------------
# pure-JAX f32 reference (mirrors the PyTorch module)
# ----------------------------------------------------------------------------
def encoder_block_ref(x, params, num_heads, eps=1e-12):
    B, S, E = x.shape
    H = num_heads
    dh = E // H
    rows = B * S
    scale = 1.0 / math.sqrt(dh)
    x2 = x.reshape(rows, E)

    qkv = x2 @ params["w_qkv"] + params["b_qkv"]
    q, k, v = jnp.split(qkv, 3, axis=-1)

    def split_heads(t):
        return t.reshape(B, S, H, dh).transpose(0, 2, 1, 3)

    q, k, v = split_heads(q), split_heads(k), split_heads(v)
    s = jnp.einsum("bhqd,bhkd->bhqk", q, k) * scale
    p = jax.nn.softmax(s, axis=-1)
    o = jnp.einsum("bhqk,bhkd->bhqd", p, v)
    o = o.transpose(0, 2, 1, 3).reshape(rows, H * dh)
    attn_out = o @ params["w_o"] + params["b_o"]

    def layer_norm(y, gamma, beta):
        mean = jnp.mean(y, axis=-1, keepdims=True)
        var = jnp.sum((y - mean) ** 2, axis=-1, keepdims=True) / (y.shape[-1] - 1)
        return gamma * (y - mean) / jnp.sqrt(var + eps) + beta

    out1 = layer_norm(attn_out + x2, params["gamma1"], params["beta1"])
    hidden = jnp.maximum(out1 @ params["w1"] + params["b1"], 0.0)
    out2 = layer_norm(hidden @ params["w2"] + params["b2"] + out1,
                      params["gamma2"], params["beta2"])
    return out2.reshape(B, S, E)


if __name__ == "__main__":
    batch, seq, emb_dim = 2, 8, 32
    num_heads, ff_dim = 4, 64
    d_head = emb_dim // num_heads

    key = jax.random.PRNGKey(0)
    ks = jax.random.split(key, 10)
    init = 0.1
    params = {
        "w_qkv": jax.random.normal(ks[0], (emb_dim, 3 * num_heads * d_head), jnp.float32) * init,
        "b_qkv": jax.random.normal(ks[1], (3 * num_heads * d_head,), jnp.float32) * init,
        "w_o": jax.random.normal(ks[2], (num_heads * d_head, emb_dim), jnp.float32) * init,
        "b_o": jax.random.normal(ks[3], (emb_dim,), jnp.float32) * init,
        "gamma1": jnp.ones((emb_dim,), jnp.float32),
        "beta1": jnp.zeros((emb_dim,), jnp.float32),
        "w1": jax.random.normal(ks[4], (emb_dim, ff_dim), jnp.float32) * init,
        "b1": jax.random.normal(ks[5], (ff_dim,), jnp.float32) * init,
        "w2": jax.random.normal(ks[6], (ff_dim, emb_dim), jnp.float32) * init,
        "b2": jax.random.normal(ks[7], (emb_dim,), jnp.float32) * init,
        "gamma2": jnp.ones((emb_dim,), jnp.float32),
        "beta2": jnp.zeros((emb_dim,), jnp.float32),
    }

    x = jax.random.normal(ks[8], (batch, seq, emb_dim), dtype=jnp.float32)

    out = encoder_block(x, params, num_heads=num_heads)
    out = jax.block_until_ready(out)

    ref = encoder_block_ref(x, params, num_heads)
    assert out.shape == (batch, seq, emb_dim)
    # bf16 MXU operands / bf16 intermediates -> loosened tolerance vs f32 ref.
    assert jnp.allclose(out.astype(jnp.float32), ref, atol=3e-2, rtol=3e-2), \
        "mismatch vs reference"

    print("KERNEL_OK")
</pallas_src>

<mosaic_0001>
module attributes {stable_mosaic.version = 11 : i64} {
  func.func @_matmul_bias_kernel(%arg0: i32, %arg1: i32, %arg2: i32, %arg3: memref<16x32xf32, #tpu.memory_space<vmem>>, %arg4: memref<32x96xbf16, #tpu.memory_space<vmem>>, %arg5: memref<1x96xf32, #tpu.memory_space<vmem>>, %arg6: memref<16x96xbf16, #tpu.memory_space<vmem>>, %arg7: memref<16x96xf32, #tpu.memory_space<vmem>>) attributes {dimension_semantics = [#tpu.dimension_semantics<parallel>, #tpu.dimension_semantics<parallel>, #tpu.dimension_semantics<arbitrary>], iteration_bounds = array<i64: 1, 1, 1>, scalar_prefetch = 0 : i64, scratch_operands = 1 : i64, tpu.core_type = #tpu.core_type<tc>, window_params = [{transform_indices = @transform_0, window_bounds = array<i64: 16, 32>}, {transform_indices = @transform_1, window_bounds = array<i64: 32, 96>}, {transform_indices = @transform_2, window_bounds = array<i64: 1, 96>}, {transform_indices = @transform_3, window_bounds = array<i64: 16, 96>}]} {
    %c0_i32 = arith.constant 0 : i32
    %0 = arith.cmpi eq, %arg2, %c0_i32 : i32
    %1 = arith.extui %0 : i1 to i32
    %c0_i32_0 = arith.constant 0 : i32
    %2 = arith.cmpi ne, %1, %c0_i32_0 : i32
    scf.if %2 {
      %cst_10 = arith.constant 0.000000e+00 : f32
      %13 = vector.broadcast %cst_10 : f32 to vector<16x96xf32>
      %c0_11 = arith.constant 0 : index
      %c0_12 = arith.constant 0 : index
      %14 = vector.load %arg7[%c0_11, %c0_12] : memref<16x96xf32, #tpu.memory_space<vmem>>, vector<16x96xf32>
      tpu.vector_store %arg7[%c0_11, %c0_12], %13 {strides = array<i32>} : memref<16x96xf32, #tpu.memory_space<vmem>>, vector<16x96xf32>,
    } else {
    }
    %c0 = arith.constant 0 : index
    %c0_1 = arith.constant 0 : index
    %3 = vector.load %arg7[%c0, %c0_1] : memref<16x96xf32, #tpu.memory_space<vmem>>, vector<16x96xf32>
    %c0_2 = arith.constant 0 : index
    %c0_3 = arith.constant 0 : index
    %4 = vector.load %arg3[%c0_2, %c0_3] : memref<16x32xf32, #tpu.memory_space<vmem>>, vector<16x32xf32>
    %5 = arith.truncf %4 : vector<16x32xf32> to vector<16x32xbf16>
    %c0_4 = arith.constant 0 : index
    %c0_5 = arith.constant 0 : index
    %6 = vector.load %arg4[%c0_4, %c0_5] : memref<32x96xbf16, #tpu.memory_space<vmem>>, vector<32x96xbf16>
    %cst = arith.constant dense<0.000000e+00> : vector<16x96xf32>
    %7 = tpu.matmul %5, %6, %cst {dimension_numbers = #tpu.dot_dimension_numbers<[1], [0], [0], [1], [0, 0, 1, 1], [], []>} : vector<16x32xbf16>, vector<32x96xbf16>, vector<16x96xf32> -> vector<16x96xf32>
    %8 = arith.addf %3, %7 : vector<16x96xf32>
    %c0_6 = arith.constant 0 : index
    %c0_7 = arith.constant 0 : index
    %9 = vector.load %arg7[%c0_6, %c0_7] : memref<16x96xf32, #tpu.memory_space<vmem>>, vector<16x96xf32>
    tpu.vector_store %arg7[%c0_6, %c0_7], %8 {strides = array<i32>} : memref<16x96xf32, #tpu.memory_space<vmem>>, vector<16x96xf32>,
    %c0_i32_8 = arith.constant 0 : i32
    %10 = arith.cmpi eq, %arg2, %c0_i32_8 : i32
    %11 = arith.extui %10 : i1 to i32
    %c0_i32_9 = arith.constant 0 : i32
    %12 = arith.cmpi ne, %11, %c0_i32_9 : i32
    scf.if %12 {
      %c0_10 = arith.constant 0 : index
      %c0_11 = arith.constant 0 : index
      %13 = vector.load %arg7[%c0_10, %c0_11] : memref<16x96xf32, #tpu.memory_space<vmem>>, vector<16x96xf32>
      %c0_12 = arith.constant 0 : index
      %c0_13 = arith.constant 0 : index
      %14 = vector.load %arg5[%c0_12, %c0_13] : memref<1x96xf32, #tpu.memory_space<vmem>>, vector<1x96xf32>
      %15 = vector.broadcast %14 : vector<1x96xf32> to vector<16x96xf32>
      %16 = arith.addf %13, %15 : vector<16x96xf32>
      %17 = arith.truncf %16 : vector<16x96xf32> to vector<16x96xbf16>
      %c0_14 = arith.constant 0 : index
      %c0_15 = arith.constant 0 : index
      %18 = vector.load %arg6[%c0_14, %c0_15] : memref<16x96xbf16, #tpu.memory_space<vmem>>, vector<16x96xbf16>
      tpu.vector_store %arg6[%c0_14, %c0_15], %17 {strides = array<i32>} : memref<16x96xbf16, #tpu.memory_space<vmem>>, vector<16x96xbf16>,
    } else {
    }
    return
  }
  func.func @transform_0(%arg0: i32, %arg1: i32, %arg2: i32) -> (i32, i32) {
    %c0_i32 = arith.constant 0 : i32
    return %arg0, %arg2 : i32, i32
  }
  func.func @transform_1(%arg0: i32, %arg1: i32, %arg2: i32) -> (i32, i32) {
    %c0_i32 = arith.constant 0 : i32
    return %arg2, %arg1 : i32, i32
  }
  func.func @transform_2(%arg0: i32, %arg1: i32, %arg2: i32) -> (i32, i32) {
    %c0_i32 = arith.constant 0 : i32
    %c0_i32_0 = arith.constant 0 : i32
    return %c0_i32, %arg1 : i32, i32
  }
  func.func @transform_3(%arg0: i32, %arg1: i32, %arg2: i32) -> (i32, i32) {
    %c0_i32 = arith.constant 0 : i32
    return %arg0, %arg1 : i32, i32
  }
}

module attributes {stable_mosaic.version = 11 : i64} {
  func.func @_attention_kernel(%arg0: i32, %arg1: memref<8x96xbf16, #tpu.memory_space<vmem>>, %arg2: memref<8x32xbf16, #tpu.memory_space<vmem>>) attributes {dimension_semantics = [#tpu.dimension_semantics<parallel>], iteration_bounds = array<i64: 2>, scalar_prefetch = 0 : i64, scratch_operands = 0 : i64, tpu.core_type = #tpu.core_type<tc>, window_params = [{transform_indices = @transform_0, window_bounds = array<i64: 8, 96>}, {transform_indices = @transform_1, window_bounds = array<i64: 8, 32>}]} {
    %c0 = arith.constant 0 : index
    %c0_0 = arith.constant 0 : index
    %0 = vector.load %arg1[%c0, %c0_0] : memref<8x96xbf16, #tpu.memory_space<vmem>>, vector<8x96xbf16>
    %1 = vector.extract_strided_slice %0 {offsets = [0, 0], sizes = [8, 8], strides = [1, 1]} : vector<8x96xbf16> to vector<8x8xbf16>
    %2 = vector.extract_strided_slice %0 {offsets = [0, 32], sizes = [8, 8], strides = [1, 1]} : vector<8x96xbf16> to vector<8x8xbf16>
    %3 = vector.extract_strided_slice %0 {offsets = [0, 64], sizes = [8, 8], strides = [1, 1]} : vector<8x96xbf16> to vector<8x8xbf16>
    %cst = arith.constant dense<0.000000e+00> : vector<8x8xf32>
    %4 = tpu.matmul %1, %2, %cst {dimension_numbers = #tpu.dot_dimension_numbers<[1], [1], [0], [0], [0, 0, 1, 0], [], []>} : vector<8x8xbf16>, vector<8x8xbf16>, vector<8x8xf32> -> vector<8x8xf32>
    %cst_1 = arith.constant 0.353553385 : f32
    %5 = vector.broadcast %cst_1 : f32 to vector<8x8xf32>
    %6 = arith.mulf %4, %5 : vector<8x8xf32>
    %cst_2 = arith.constant dense<0xFF800000> : vector<8xf32>
    %7 = vector.multi_reduction <maximumf>, %6, %cst_2 [1] : vector<8x8xf32> to vector<8xf32>
    %8 = vector.shape_cast %7 : vector<8xf32> to vector<8x1xf32>
    %9 = vector.broadcast %8 : vector<8x1xf32> to vector<8x8xf32>
    %10 = arith.subf %6, %9 : vector<8x8xf32>
    %11 = math.exp %10 : vector<8x8xf32>
    %cst_3 = arith.constant dense<0.000000e+00> : vector<8xf32>
    %12 = vector.multi_reduction <add>, %11, %cst_3 [1] : vector<8x8xf32> to vector<8xf32>
    %13 = vector.shape_cast %12 : vector<8xf32> to vector<8x1xf32>
    %14 = arith.truncf %11 : vector<8x8xf32> to vector<8x8xbf16>
    %cst_4 = arith.constant dense<0.000000e+00> : vector<8x8xf32>
    %15 = tpu.matmul %14, %3, %cst_4 {dimension_numbers = #tpu.dot_dimension_numbers<[1], [0], [0], [1], [0, 0, 1, 1], [], []>} : vector<8x8xbf16>, vector<8x8xbf16>, vector<8x8xf32> -> vector<8x8xf32>
    %16 = tpu.reciprocal %13 {approx = true} : vector<8x1xf32> -> vector<8x1xf32>
    %17 = vector.broadcast %16 : vector<8x1xf32> to vector<8x8xf32>
    %18 = arith.mulf %15, %17 : vector<8x8xf32>
    %19 = arith.truncf %18 : vector<8x8xf32> to vector<8x8xbf16>
    %c0_5 = arith.constant 0 : index
    %c0_6 = arith.constant 0 : index
    %20 = vector.load %arg2[%c0_5, %c0_6] : memref<8x32xbf16, #tpu.memory_space<vmem>>, vector<8x8xbf16>
    tpu.vector_store %arg2[%c0_5, %c0_6], %19 {strides = array<i32>} : memref<8x32xbf16, #tpu.memory_space<vmem>>, vector<8x8xbf16>,
    %21 = vector.extract_strided_slice %0 {offsets = [0, 8], sizes = [8, 8], strides = [1, 1]} : vector<8x96xbf16> to vector<8x8xbf16>
    %22 = vector.extract_strided_slice %0 {offsets = [0, 40], sizes = [8, 8], strides = [1, 1]} : vector<8x96xbf16> to vector<8x8xbf16>
    %23 = vector.extract_strided_slice %0 {offsets = [0, 72], sizes = [8, 8], strides = [1, 1]} : vector<8x96xbf16> to vector<8x8xbf16>
    %cst_7 = arith.constant dense<0.000000e+00> : vector<8x8xf32>
    %24 = tpu.matmul %21, %22, %cst_7 {dimension_numbers = #tpu.dot_dimension_numbers<[1], [1], [0], [0], [0, 0, 1, 0], [], []>} : vector<8x8xbf16>, vector<8x8xbf16>, vector<8x8xf32> -> vector<8x8xf32>
    %cst_8 = arith.constant 0.353553385 : f32
    %25 = vector.broadcast %cst_8 : f32 to vector<8x8xf32>
    %26 = arith.mulf %24, %25 : vector<8x8xf32>
    %cst_9 = arith.constant dense<0xFF800000> : vector<8xf32>
    %27 = vector.multi_reduction <maximumf>, %26, %cst_9 [1] : vector<8x8xf32> to vector<8xf32>
    %28 = vector.shape_cast %27 : vector<8xf32> to vector<8x1xf32>
    %29 = vector.broadcast %28 : vector<8x1xf32> to vector<8x8xf32>
    %30 = arith.subf %26, %29 : vector<8x8xf32>
    %31 = math.exp %30 : vector<8x8xf32>
    %cst_10 = arith.constant dense<0.000000e+00> : vector<8xf32>
    %32 = vector.multi_reduction <add>, %31, %cst_10 [1] : vector<8x8xf32> to vector<8xf32>
    %33 = vector.shape_cast %32 : vector<8xf32> to vector<8x1xf32>
    %34 = arith.truncf %31 : vector<8x8xf32> to vector<8x8xbf16>
    %cst_11 = arith.constant dense<0.000000e+00> : vector<8x8xf32>
    %35 = tpu.matmul %34, %23, %cst_11 {dimension_numbers = #tpu.dot_dimension_numbers<[1], [0], [0], [1], [0, 0, 1, 1], [], []>} : vector<8x8xbf16>, vector<8x8xbf16>, vector<8x8xf32> -> vector<8x8xf32>
    %36 = tpu.reciprocal %33 {approx = true} : vector<8x1xf32> -> vector<8x1xf32>
    %37 = vector.broadcast %36 : vector<8x1xf32> to vector<8x8xf32>
    %38 = arith.mulf %35, %37 : vector<8x8xf32>
    %39 = arith.truncf %38 : vector<8x8xf32> to vector<8x8xbf16>
    %c0_12 = arith.constant 0 : index
    %c8 = arith.constant 8 : index
    %40 = vector.load %arg2[%c0_12, %c8] : memref<8x32xbf16, #tpu.memory_space<vmem>>, vector<8x8xbf16>
    tpu.vector_store %arg2[%c0_12, %c8], %39 {strides = array<i32>} : memref<8x32xbf16, #tpu.memory_space<vmem>>, vector<8x8xbf16>,
    %41 = vector.extract_strided_slice %0 {offsets = [0, 16], sizes = [8, 8], strides = [1, 1]} : vector<8x96xbf16> to vector<8x8xbf16>
    %42 = vector.extract_strided_slice %0 {offsets = [0, 48], sizes = [8, 8], strides = [1, 1]} : vector<8x96xbf16> to vector<8x8xbf16>
    %43 = vector.extract_strided_slice %0 {offsets = [0, 80], sizes = [8, 8], strides = [1, 1]} : vector<8x96xbf16> to vector<8x8xbf16>
    %cst_13 = arith.constant dense<0.000000e+00> : vector<8x8xf32>
    %44 = tpu.matmul %41, %42, %cst_13 {dimension_numbers = #tpu.dot_dimension_numbers<[1], [1], [0], [0], [0, 0, 1, 0], [], []>} : vector<8x8xbf16>, vector<8x8xbf16>, vector<8x8xf32> -> vector<8x8xf32>
    %cst_14 = arith.constant 0.353553385 : f32
    %45 = vector.broadcast %cst_14 : f32 to vector<8x8xf32>
    %46 = arith.mulf %44, %45 : vector<8x8xf32>
    %cst_15 = arith.constant dense<0xFF800000> : vector<8xf32>
    %47 = vector.multi_reduction <maximumf>, %46, %cst_15 [1] : vector<8x8xf32> to vector<8xf32>
    %48 = vector.shape_cast %47 : vector<8xf32> to vector<8x1xf32>
    %49 = vector.broadcast %48 : vector<8x1xf32> to vector<8x8xf32>
    %50 = arith.subf %46, %49 : vector<8x8xf32>
    %51 = math.exp %50 : vector<8x8xf32>
    %cst_16 = arith.constant dense<0.000000e+00> : vector<8xf32>
    %52 = vector.multi_reduction <add>, %51, %cst_16 [1] : vector<8x8xf32> to vector<8xf32>
    %53 = vector.shape_cast %52 : vector<8xf32> to vector<8x1xf32>
    %54 = arith.truncf %51 : vector<8x8xf32> to vector<8x8xbf16>
    %cst_17 = arith.constant dense<0.000000e+00> : vector<8x8xf32>
    %55 = tpu.matmul %54, %43, %cst_17 {dimension_numbers = #tpu.dot_dimension_numbers<[1], [0], [0], [1], [0, 0, 1, 1], [], []>} : vector<8x8xbf16>, vector<8x8xbf16>, vector<8x8xf32> -> vector<8x8xf32>
    %56 = tpu.reciprocal %53 {approx = true} : vector<8x1xf32> -> vector<8x1xf32>
    %57 = vector.broadcast %56 : vector<8x1xf32> to vector<8x8xf32>
    %58 = arith.mulf %55, %57 : vector<8x8xf32>
    %59 = arith.truncf %58 : vector<8x8xf32> to vector<8x8xbf16>
    %c0_18 = arith.constant 0 : index
    %c16 = arith.constant 16 : index
    %60 = vector.load %arg2[%c0_18, %c16] : memref<8x32xbf16, #tpu.memory_space<vmem>>, vector<8x8xbf16>
    tpu.vector_store %arg2[%c0_18, %c16], %59 {strides = array<i32>} : memref<8x32xbf16, #tpu.memory_space<vmem>>, vector<8x8xbf16>,
    %61 = vector.extract_strided_slice %0 {offsets = [0, 24], sizes = [8, 8], strides = [1, 1]} : vector<8x96xbf16> to vector<8x8xbf16>
    %62 = vector.extract_strided_slice %0 {offsets = [0, 56], sizes = [8, 8], strides = [1, 1]} : vector<8x96xbf16> to vector<8x8xbf16>
    %63 = vector.extract_strided_slice %0 {offsets = [0, 88], sizes = [8, 8], strides = [1, 1]} : vector<8x96xbf16> to vector<8x8xbf16>
    %cst_19 = arith.constant dense<0.000000e+00> : vector<8x8xf32>
    %64 = tpu.matmul %61, %62, %cst_19 {dimension_numbers = #tpu.dot_dimension_numbers<[1], [1], [0], [0], [0, 0, 1, 0], [], []>} : vector<8x8xbf16>, vector<8x8xbf16>, vector<8x8xf32> -> vector<8x8xf32>
    %cst_20 = arith.constant 0.353553385 : f32
    %65 = vector.broadcast %cst_20 : f32 to vector<8x8xf32>
    %66 = arith.mulf %64, %65 : vector<8x8xf32>
    %cst_21 = arith.constant dense<0xFF800000> : vector<8xf32>
    %67 = vector.multi_reduction <maximumf>, %66, %cst_21 [1] : vector<8x8xf32> to vector<8xf32>
    %68 = vector.shape_cast %67 : vector<8xf32> to vector<8x1xf32>
    %69 = vector.broadcast %68 : vector<8x1xf32> to vector<8x8xf32>
    %70 = arith.subf %66, %69 : vector<8x8xf32>
    %71 = math.exp %70 : vector<8x8xf32>
    %cst_22 = arith.constant dense<0.000000e+00> : vector<8xf32>
    %72 = vector.multi_reduction <add>, %71, %cst_22 [1] : vector<8x8xf32> to vector<8xf32>
    %73 = vector.shape_cast %72 : vector<8xf32> to vector<8x1xf32>
    %74 = arith.truncf %71 : vector<8x8xf32> to vector<8x8xbf16>
    %cst_23 = arith.constant dense<0.000000e+00> : vector<8x8xf32>
    %75 = tpu.matmul %74, %63, %cst_23 {dimension_numbers = #tpu.dot_dimension_numbers<[1], [0], [0], [1], [0, 0, 1, 1], [], []>} : vector<8x8xbf16>, vector<8x8xbf16>, vector<8x8xf32> -> vector<8x8xf32>
    %76 = tpu.reciprocal %73 {approx = true} : vector<8x1xf32> -> vector<8x1xf32>
    %77 = vector.broadcast %76 : vector<8x1xf32> to vector<8x8xf32>
    %78 = arith.mulf %75, %77 : vector<8x8xf32>
    %79 = arith.truncf %78 : vector<8x8xf32> to vector<8x8xbf16>
    %c0_24 = arith.constant 0 : index
    %c24 = arith.constant 24 : index
    %80 = vector.load %arg2[%c0_24, %c24] : memref<8x32xbf16, #tpu.memory_space<vmem>>, vector<8x8xbf16>
    tpu.vector_store %arg2[%c0_24, %c24], %79 {strides = array<i32>} : memref<8x32xbf16, #tpu.memory_space<vmem>>, vector<8x8xbf16>,
    return
  }
  func.func @transform_0(%arg0: i32) -> (i32, i32) {
    %c0_i32 = arith.constant 0 : i32
    %c0_i32_0 = arith.constant 0 : i32
    return %arg0, %c0_i32 : i32, i32
  }
  func.func @transform_1(%arg0: i32) -> (i32, i32) {
    %c0_i32 = arith.constant 0 : i32
    %c0_i32_0 = arith.constant 0 : i32
    return %arg0, %c0_i32 : i32, i32
  }
}

module attributes {stable_mosaic.version = 11 : i64} {
  func.func @_matmul_bias_res_ln_kernel(%arg0: i32, %arg1: i32, %arg2: memref<16x32xbf16, #tpu.memory_space<vmem>>, %arg3: memref<32x32xbf16, #tpu.memory_space<vmem>>, %arg4: memref<1x32xf32, #tpu.memory_space<vmem>>, %arg5: memref<16x32xf32, #tpu.memory_space<vmem>>, %arg6: memref<1x32xf32, #tpu.memory_space<vmem>>, %arg7: memref<1x32xf32, #tpu.memory_space<vmem>>, %arg8: memref<16x32xf32, #tpu.memory_space<vmem>>, %arg9: memref<16x32xf32, #tpu.memory_space<vmem>>) attributes {dimension_semantics = [#tpu.dimension_semantics<parallel>, #tpu.dimension_semantics<arbitrary>], iteration_bounds = array<i64: 1, 1>, scalar_prefetch = 0 : i64, scratch_operands = 1 : i64, tpu.core_type = #tpu.core_type<tc>, window_params = [{transform_indices = @transform_0, window_bounds = array<i64: 16, 32>}, {transform_indices = @transform_1, window_bounds = array<i64: 32, 32>}, {pipeline_mode = #tpu.pipeline_mode<synchronous>, transform_indices = @transform_2, window_bounds = array<i64: 1, 32>}, {transform_indices = @transform_3, window_bounds = array<i64: 16, 32>}, {pipeline_mode = #tpu.pipeline_mode<synchronous>, transform_indices = @transform_4, window_bounds = array<i64: 1, 32>}, {pipeline_mode = #tpu.pipeline_mode<synchronous>, transform_indices = @transform_5, window_bounds = array<i64: 1, 32>}, {transform_indices = @transform_6, window_bounds = array<i64: 16, 32>}]} {
    %c0_i32 = arith.constant 0 : i32
    %0 = arith.cmpi eq, %arg1, %c0_i32 : i32
    %1 = arith.extui %0 : i1 to i32
    %c0_i32_0 = arith.constant 0 : i32
    %2 = arith.cmpi ne, %1, %c0_i32_0 : i32
    scf.if %2 {
      %cst_10 = arith.constant 0.000000e+00 : f32
      %12 = vector.broadcast %cst_10 : f32 to vector<16x32xf32>
      %c0_11 = arith.constant 0 : index
      %c0_12 = arith.constant 0 : index
      %13 = vector.load %arg9[%c0_11, %c0_12] : memref<16x32xf32, #tpu.memory_space<vmem>>, vector<16x32xf32>
      tpu.vector_store %arg9[%c0_11, %c0_12], %12 {strides = array<i32>} : memref<16x32xf32, #tpu.memory_space<vmem>>, vector<16x32xf32>,
    } else {
    }
    %c0 = arith.constant 0 : index
    %c0_1 = arith.constant 0 : index
    %3 = vector.load %arg9[%c0, %c0_1] : memref<16x32xf32, #tpu.memory_space<vmem>>, vector<16x32xf32>
    %c0_2 = arith.constant 0 : index
    %c0_3 = arith.constant 0 : index
    %4 = vector.load %arg2[%c0_2, %c0_3] : memref<16x32xbf16, #tpu.memory_space<vmem>>, vector<16x32xbf16>
    %c0_4 = arith.constant 0 : index
    %c0_5 = arith.constant 0 : index
    %5 = vector.load %arg3[%c0_4, %c0_5] : memref<32x32xbf16, #tpu.memory_space<vmem>>, vector<32x32xbf16>
    %cst = arith.constant dense<0.000000e+00> : vector<16x32xf32>
    %6 = tpu.matmul %4, %5, %cst {dimension_numbers = #tpu.dot_dimension_numbers<[1], [0], [0], [1], [0, 0, 1, 1], [], []>} : vector<16x32xbf16>, vector<32x32xbf16>, vector<16x32xf32> -> vector<16x32xf32>
    %7 = arith.addf %3, %6 : vector<16x32xf32>
    %c0_6 = arith.constant 0 : index
    %c0_7 = arith.constant 0 : index
    %8 = vector.load %arg9[%c0_6, %c0_7] : memref<16x32xf32, #tpu.memory_space<vmem>>, vector<16x32xf32>
    tpu.vector_store %arg9[%c0_6, %c0_7], %7 {strides = array<i32>} : memref<16x32xf32, #tpu.memory_space<vmem>>, vector<16x32xf32>,
    %c0_i32_8 = arith.constant 0 : i32
    %9 = arith.cmpi eq, %arg1, %c0_i32_8 : i32
    %10 = arith.extui %9 : i1 to i32
    %c0_i32_9 = arith.constant 0 : i32
    %11 = arith.cmpi ne, %10, %c0_i32_9 : i32
    scf.if %11 {
      %c0_10 = arith.constant 0 : index
      %c0_11 = arith.constant 0 : index
      %12 = vector.load %arg9[%c0_10, %c0_11] : memref<16x32xf32, #tpu.memory_space<vmem>>, vector<16x32xf32>
      %c0_12 = arith.constant 0 : index
      %c0_13 = arith.constant 0 : index
      %13 = vector.load %arg4[%c0_12, %c0_13] : memref<1x32xf32, #tpu.memory_space<vmem>>, vector<1x32xf32>
      %14 = vector.broadcast %13 : vector<1x32xf32> to vector<16x32xf32>
      %15 = arith.addf %12, %14 : vector<16x32xf32>
      %c0_14 = arith.constant 0 : index
      %c0_15 = arith.constant 0 : index
      %16 = vector.load %arg5[%c0_14, %c0_15] : memref<16x32xf32, #tpu.memory_space<vmem>>, vector<16x32xf32>
      %17 = arith.addf %15, %16 : vector<16x32xf32>
      %cst_16 = arith.constant dense<0.000000e+00> : vector<16xf32>
      %18 = vector.multi_reduction <add>, %17, %cst_16 [1] : vector<16x32xf32> to vector<16xf32>
      %19 = vector.shape_cast %18 : vector<16xf32> to vector<16x1xf32>
      %cst_17 = arith.constant 3.125000e-02 : f32
      %20 = vector.broadcast %cst_17 : f32 to vector<16x1xf32>
      %21 = arith.mulf %19, %20 : vector<16x1xf32>
      %22 = vector.broadcast %21 : vector<16x1xf32> to vector<16x32xf32>
      %23 = arith.subf %17, %22 : vector<16x32xf32>
      %24 = arith.mulf %23, %23 : vector<16x32xf32>
      %cst_18 = arith.constant dense<0.000000e+00> : vector<16xf32>
      %25 = vector.multi_reduction <add>, %24, %cst_18 [1] : vector<16x32xf32> to vector<16xf32>
      %26 = vector.shape_cast %25 : vector<16xf32> to vector<16x1xf32>
      %cst_19 = arith.constant 0.0322580636 : f32
      %27 = vector.broadcast %cst_19 : f32 to vector<16x1xf32>
      %28 = arith.mulf %26, %27 : vector<16x1xf32>
      %cst_20 = arith.constant 9.99999996E-13 : f32
      %29 = vector.broadcast %cst_20 : f32 to vector<16x1xf32>
      %30 = arith.addf %28, %29 : vector<16x1xf32>
      %31 = math.rsqrt %30 : vector<16x1xf32>
      %32 = vector.broadcast %31 : vector<16x1xf32> to vector<16x32xf32>
      %33 = arith.mulf %23, %32 : vector<16x32xf32>
      %c0_21 = arith.constant 0 : index
      %c0_22 = arith.constant 0 : index
      %34 = vector.load %arg6[%c0_21, %c0_22] : memref<1x32xf32, #tpu.memory_space<vmem>>, vector<1x32xf32>
      %35 = vector.broadcast %34 : vector<1x32xf32> to vector<16x32xf32>
      %36 = arith.mulf %35, %33 : vector<16x32xf32>
      %c0_23 = arith.constant 0 : index
      %c0_24 = arith.constant 0 : index
      %37 = vector.load %arg7[%c0_23, %c0_24] : memref<1x32xf32, #tpu.memory_space<vmem>>, vector<1x32xf32>
      %38 = vector.broadcast %37 : vector<1x32xf32> to vector<16x32xf32>
      %39 = arith.addf %36, %38 : vector<16x32xf32>
      %c0_25 = arith.constant 0 : index
      %c0_26 = arith.constant 0 : index
      %40 = vector.load %arg8[%c0_25, %c0_26] : memref<16x32xf32, #tpu.memory_space<vmem>>, vector<16x32xf32>
      tpu.vector_store %arg8[%c0_25, %c0_26], %39 {strides = array<i32>} : memref<16x32xf32, #tpu.memory_space<vmem>>, vector<16x32xf32>,
    } else {
    }
    return
  }
  func.func @transform_0(%arg0: i32, %arg1: i32) -> (i32, i32) {
    %c0_i32 = arith.constant 0 : i32
    return %arg0, %arg1 : i32, i32
  }
  func.func @transform_1(%arg0: i32, %arg1: i32) -> (i32, i32) {
    %c0_i32 = arith.constant 0 : i32
    %c0_i32_0 = arith.constant 0 : i32
    return %arg1, %c0_i32 : i32, i32
  }
  func.func @transform_2(%arg0: i32, %arg1: i32) -> (i32, i32) {
    %c0_i32 = arith.constant 0 : i32
    %c0_i32_0 = arith.constant 0 : i32
    %c0_i32_1 = arith.constant 0 : i32
    return %c0_i32, %c0_i32_0 : i32, i32
  }
  func.func @transform_3(%arg0: i32, %arg1: i32) -> (i32, i32) {
    %c0_i32 = arith.constant 0 : i32
    %c0_i32_0 = arith.constant 0 : i32
    return %arg0, %c0_i32 : i32, i32
  }
  func.func @transform_4(%arg0: i32, %arg1: i32) -> (i32, i32) {
    %c0_i32 = arith.constant 0 : i32
    %c0_i32_0 = arith.constant 0 : i32
    %c0_i32_1 = arith.constant 0 : i32
    return %c0_i32, %c0_i32_0 : i32, i32
  }
  func.func @transform_5(%arg0: i32, %arg1: i32) -> (i32, i32) {
    %c0_i32 = arith.constant 0 : i32
    %c0_i32_0 = arith.constant 0 : i32
    %c0_i32_1 = arith.constant 0 : i32
    return %c0_i32, %c0_i32_0 : i32, i32
  }
  func.func @transform_6(%arg0: i32, %arg1: i32) -> (i32, i32) {
    %c0_i32 = arith.constant 0 : i32
    %c0_i32_0 = arith.constant 0 : i32
    return %arg0, %c0_i32 : i32, i32
  }
}

module attributes {stable_mosaic.version = 11 : i64} {
  func.func @_matmul_bias_kernel(%arg0: i32, %arg1: i32, %arg2: i32, %arg3: memref<16x32xf32, #tpu.memory_space<vmem>>, %arg4: memref<32x64xbf16, #tpu.memory_space<vmem>>, %arg5: memref<1x64xf32, #tpu.memory_space<vmem>>, %arg6: memref<16x64xbf16, #tpu.memory_space<vmem>>, %arg7: memref<16x64xf32, #tpu.memory_space<vmem>>) attributes {dimension_semantics = [#tpu.dimension_semantics<parallel>, #tpu.dimension_semantics<parallel>, #tpu.dimension_semantics<arbitrary>], iteration_bounds = array<i64: 1, 1, 1>, scalar_prefetch = 0 : i64, scratch_operands = 1 : i64, tpu.core_type = #tpu.core_type<tc>, window_params = [{transform_indices = @transform_0, window_bounds = array<i64: 16, 32>}, {transform_indices = @transform_1, window_bounds = array<i64: 32, 64>}, {transform_indices = @transform_2, window_bounds = array<i64: 1, 64>}, {transform_indices = @transform_3, window_bounds = array<i64: 16, 64>}]} {
    %c0_i32 = arith.constant 0 : i32
    %0 = arith.cmpi eq, %arg2, %c0_i32 : i32
    %1 = arith.extui %0 : i1 to i32
    %c0_i32_0 = arith.constant 0 : i32
    %2 = arith.cmpi ne, %1, %c0_i32_0 : i32
    scf.if %2 {
      %cst_10 = arith.constant 0.000000e+00 : f32
      %13 = vector.broadcast %cst_10 : f32 to vector<16x64xf32>
      %c0_11 = arith.constant 0 : index
      %c0_12 = arith.constant 0 : index
      %14 = vector.load %arg7[%c0_11, %c0_12] : memref<16x64xf32, #tpu.memory_space<vmem>>, vector<16x64xf32>
      tpu.vector_store %arg7[%c0_11, %c0_12], %13 {strides = array<i32>} : memref<16x64xf32, #tpu.memory_space<vmem>>, vector<16x64xf32>,
    } else {
    }
    %c0 = arith.constant 0 : index
    %c0_1 = arith.constant 0 : index
    %3 = vector.load %arg7[%c0, %c0_1] : memref<16x64xf32, #tpu.memory_space<vmem>>, vector<16x64xf32>
    %c0_2 = arith.constant 0 : index
    %c0_3 = arith.constant 0 : index
    %4 = vector.load %arg3[%c0_2, %c0_3] : memref<16x32xf32, #tpu.memory_space<vmem>>, vector<16x32xf32>
    %5 = arith.truncf %4 : vector<16x32xf32> to vector<16x32xbf16>
    %c0_4 = arith.constant 0 : index
    %c0_5 = arith.constant 0 : index
    %6 = vector.load %arg4[%c0_4, %c0_5] : memref<32x64xbf16, #tpu.memory_space<vmem>>, vector<32x64xbf16>
    %cst = arith.constant dense<0.000000e+00> : vector<16x64xf32>
    %7 = tpu.matmul %5, %6, %cst {dimension_numbers = #tpu.dot_dimension_numbers<[1], [0], [0], [1], [0, 0, 1, 1], [], []>} : vector<16x32xbf16>, vector<32x64xbf16>, vector<16x64xf32> -> vector<16x64xf32>
    %8 = arith.addf %3, %7 : vector<16x64xf32>
    %c0_6 = arith.constant 0 : index
    %c0_7 = arith.constant 0 : index
    %9 = vector.load %arg7[%c0_6, %c0_7] : memref<16x64xf32, #tpu.memory_space<vmem>>, vector<16x64xf32>
    tpu.vector_store %arg7[%c0_6, %c0_7], %8 {strides = array<i32>} : memref<16x64xf32, #tpu.memory_space<vmem>>, vector<16x64xf32>,
    %c0_i32_8 = arith.constant 0 : i32
    %10 = arith.cmpi eq, %arg2, %c0_i32_8 : i32
    %11 = arith.extui %10 : i1 to i32
    %c0_i32_9 = arith.constant 0 : i32
    %12 = arith.cmpi ne, %11, %c0_i32_9 : i32
    scf.if %12 {
      %c0_10 = arith.constant 0 : index
      %c0_11 = arith.constant 0 : index
      %13 = vector.load %arg7[%c0_10, %c0_11] : memref<16x64xf32, #tpu.memory_space<vmem>>, vector<16x64xf32>
      %c0_12 = arith.constant 0 : index
      %c0_13 = arith.constant 0 : index
      %14 = vector.load %arg5[%c0_12, %c0_13] : memref<1x64xf32, #tpu.memory_space<vmem>>, vector<1x64xf32>
      %15 = vector.broadcast %14 : vector<1x64xf32> to vector<16x64xf32>
      %16 = arith.addf %13, %15 : vector<16x64xf32>
      %cst_14 = arith.constant 0.000000e+00 : f32
      %17 = vector.broadcast %cst_14 : f32 to vector<16x64xf32>
      %18 = arith.maximumf %16, %17 : vector<16x64xf32>
      %19 = arith.truncf %18 : vector<16x64xf32> to vector<16x64xbf16>
      %c0_15 = arith.constant 0 : index
      %c0_16 = arith.constant 0 : index
      %20 = vector.load %arg6[%c0_15, %c0_16] : memref<16x64xbf16, #tpu.memory_space<vmem>>, vector<16x64xbf16>
      tpu.vector_store %arg6[%c0_15, %c0_16], %19 {strides = array<i32>} : memref<16x64xbf16, #tpu.memory_space<vmem>>, vector<16x64xbf16>,
    } else {
    }
    return
  }
  func.func @transform_0(%arg0: i32, %arg1: i32, %arg2: i32) -> (i32, i32) {
    %c0_i32 = arith.constant 0 : i32
    return %arg0, %arg2 : i32, i32
  }
  func.func @transform_1(%arg0: i32, %arg1: i32, %arg2: i32) -> (i32, i32) {
    %c0_i32 = arith.constant 0 : i32
    return %arg2, %arg1 : i32, i32
  }
  func.func @transform_2(%arg0: i32, %arg1: i32, %arg2: i32) -> (i32, i32) {
    %c0_i32 = arith.constant 0 : i32
    %c0_i32_0 = arith.constant 0 : i32
    return %c0_i32, %arg1 : i32, i32
  }
  func.func @transform_3(%arg0: i32, %arg1: i32, %arg2: i32) -> (i32, i32) {
    %c0_i32 = arith.constant 0 : i32
    return %arg0, %arg1 : i32, i32
  }
}

module attributes {stable_mosaic.version = 11 : i64} {
  func.func @_matmul_bias_res_ln_kernel(%arg0: i32, %arg1: i32, %arg2: memref<16x64xbf16, #tpu.memory_space<vmem>>, %arg3: memref<64x32xbf16, #tpu.memory_space<vmem>>, %arg4: memref<1x32xf32, #tpu.memory_space<vmem>>, %arg5: memref<16x32xf32, #tpu.memory_space<vmem>>, %arg6: memref<1x32xf32, #tpu.memory_space<vmem>>, %arg7: memref<1x32xf32, #tpu.memory_space<vmem>>, %arg8: memref<16x32xf32, #tpu.memory_space<vmem>>, %arg9: memref<16x32xf32, #tpu.memory_space<vmem>>) attributes {dimension_semantics = [#tpu.dimension_semantics<parallel>, #tpu.dimension_semantics<arbitrary>], iteration_bounds = array<i64: 1, 1>, scalar_prefetch = 0 : i64, scratch_operands = 1 : i64, tpu.core_type = #tpu.core_type<tc>, window_params = [{transform_indices = @transform_0, window_bounds = array<i64: 16, 64>}, {transform_indices = @transform_1, window_bounds = array<i64: 64, 32>}, {pipeline_mode = #tpu.pipeline_mode<synchronous>, transform_indices = @transform_2, window_bounds = array<i64: 1, 32>}, {transform_indices = @transform_3, window_bounds = array<i64: 16, 32>}, {pipeline_mode = #tpu.pipeline_mode<synchronous>, transform_indices = @transform_4, window_bounds = array<i64: 1, 32>}, {pipeline_mode = #tpu.pipeline_mode<synchronous>, transform_indices = @transform_5, window_bounds = array<i64: 1, 32>}, {transform_indices = @transform_6, window_bounds = array<i64: 16, 32>}]} {
    %c0_i32 = arith.constant 0 : i32
    %0 = arith.cmpi eq, %arg1, %c0_i32 : i32
    %1 = arith.extui %0 : i1 to i32
    %c0_i32_0 = arith.constant 0 : i32
    %2 = arith.cmpi ne, %1, %c0_i32_0 : i32
    scf.if %2 {
      %cst_10 = arith.constant 0.000000e+00 : f32
      %12 = vector.broadcast %cst_10 : f32 to vector<16x32xf32>
      %c0_11 = arith.constant 0 : index
      %c0_12 = arith.constant 0 : index
      %13 = vector.load %arg9[%c0_11, %c0_12] : memref<16x32xf32, #tpu.memory_space<vmem>>, vector<16x32xf32>
      tpu.vector_store %arg9[%c0_11, %c0_12], %12 {strides = array<i32>} : memref<16x32xf32, #tpu.memory_space<vmem>>, vector<16x32xf32>,
    } else {
    }
    %c0 = arith.constant 0 : index
    %c0_1 = arith.constant 0 : index
    %3 = vector.load %arg9[%c0, %c0_1] : memref<16x32xf32, #tpu.memory_space<vmem>>, vector<16x32xf32>
    %c0_2 = arith.constant 0 : index
    %c0_3 = arith.constant 0 : index
    %4 = vector.load %arg2[%c0_2, %c0_3] : memref<16x64xbf16, #tpu.memory_space<vmem>>, vector<16x64xbf16>
    %c0_4 = arith.constant 0 : index
    %c0_5 = arith.constant 0 : index
    %5 = vector.load %arg3[%c0_4, %c0_5] : memref<64x32xbf16, #tpu.memory_space<vmem>>, vector<64x32xbf16>
    %cst = arith.constant dense<0.000000e+00> : vector<16x32xf32>
    %6 = tpu.matmul %4, %5, %cst {dimension_numbers = #tpu.dot_dimension_numbers<[1], [0], [0], [1], [0, 0, 1, 1], [], []>} : vector<16x64xbf16>, vector<64x32xbf16>, vector<16x32xf32> -> vector<16x32xf32>
    %7 = arith.addf %3, %6 : vector<16x32xf32>
    %c0_6 = arith.constant 0 : index
    %c0_7 = arith.constant 0 : index
    %8 = vector.load %arg9[%c0_6, %c0_7] : memref<16x32xf32, #tpu.memory_space<vmem>>, vector<16x32xf32>
    tpu.vector_store %arg9[%c0_6, %c0_7], %7 {strides = array<i32>} : memref<16x32xf32, #tpu.memory_space<vmem>>, vector<16x32xf32>,
    %c0_i32_8 = arith.constant 0 : i32
    %9 = arith.cmpi eq, %arg1, %c0_i32_8 : i32
    %10 = arith.extui %9 : i1 to i32
    %c0_i32_9 = arith.constant 0 : i32
    %11 = arith.cmpi ne, %10, %c0_i32_9 : i32
    scf.if %11 {
      %c0_10 = arith.constant 0 : index
      %c0_11 = arith.constant 0 : index
      %12 = vector.load %arg9[%c0_10, %c0_11] : memref<16x32xf32, #tpu.memory_space<vmem>>, vector<16x32xf32>
      %c0_12 = arith.constant 0 : index
      %c0_13 = arith.constant 0 : index
      %13 = vector.load %arg4[%c0_12, %c0_13] : memref<1x32xf32, #tpu.memory_space<vmem>>, vector<1x32xf32>
      %14 = vector.broadcast %13 : vector<1x32xf32> to vector<16x32xf32>
      %15 = arith.addf %12, %14 : vector<16x32xf32>
      %c0_14 = arith.constant 0 : index
      %c0_15 = arith.constant 0 : index
      %16 = vector.load %arg5[%c0_14, %c0_15] : memref<16x32xf32, #tpu.memory_space<vmem>>, vector<16x32xf32>
      %17 = arith.addf %15, %16 : vector<16x32xf32>
      %cst_16 = arith.constant dense<0.000000e+00> : vector<16xf32>
      %18 = vector.multi_reduction <add>, %17, %cst_16 [1] : vector<16x32xf32> to vector<16xf32>
      %19 = vector.shape_cast %18 : vector<16xf32> to vector<16x1xf32>
      %cst_17 = arith.constant 3.125000e-02 : f32
      %20 = vector.broadcast %cst_17 : f32 to vector<16x1xf32>
      %21 = arith.mulf %19, %20 : vector<16x1xf32>
      %22 = vector.broadcast %21 : vector<16x1xf32> to vector<16x32xf32>
      %23 = arith.subf %17, %22 : vector<16x32xf32>
      %24 = arith.mulf %23, %23 : vector<16x32xf32>
      %cst_18 = arith.constant dense<0.000000e+00> : vector<16xf32>
      %25 = vector.multi_reduction <add>, %24, %cst_18 [1] : vector<16x32xf32> to vector<16xf32>
      %26 = vector.shape_cast %25 : vector<16xf32> to vector<16x1xf32>
      %cst_19 = arith.constant 0.0322580636 : f32
      %27 = vector.broadcast %cst_19 : f32 to vector<16x1xf32>
      %28 = arith.mulf %26, %27 : vector<16x1xf32>
      %cst_20 = arith.constant 9.99999996E-13 : f32
      %29 = vector.broadcast %cst_20 : f32 to vector<16x1xf32>
      %30 = arith.addf %28, %29 : vector<16x1xf32>
      %31 = math.rsqrt %30 : vector<16x1xf32>
      %32 = vector.broadcast %31 : vector<16x1xf32> to vector<16x32xf32>
      %33 = arith.mulf %23, %32 : vector<16x32xf32>
      %c0_21 = arith.constant 0 : index
      %c0_22 = arith.constant 0 : index
      %34 = vector.load %arg6[%c0_21, %c0_22] : memref<1x32xf32, #tpu.memory_space<vmem>>, vector<1x32xf32>
      %35 = vector.broadcast %34 : vector<1x32xf32> to vector<16x32xf32>
      %36 = arith.mulf %35, %33 : vector<16x32xf32>
      %c0_23 = arith.constant 0 : index
      %c0_24 = arith.constant 0 : index
      %37 = vector.load %arg7[%c0_23, %c0_24] : memref<1x32xf32, #tpu.memory_space<vmem>>, vector<1x32xf32>
      %38 = vector.broadcast %37 : vector<1x32xf32> to vector<16x32xf32>
      %39 = arith.addf %36, %38 : vector<16x32xf32>
      %c0_25 = arith.constant 0 : index
      %c0_26 = arith.constant 0 : index
      %40 = vector.load %arg8[%c0_25, %c0_26] : memref<16x32xf32, #tpu.memory_space<vmem>>, vector<16x32xf32>
      tpu.vector_store %arg8[%c0_25, %c0_26], %39 {strides = array<i32>} : memref<16x32xf32, #tpu.memory_space<vmem>>, vector<16x32xf32>,
    } else {
    }
    return
  }
  func.func @transform_0(%arg0: i32, %arg1: i32) -> (i32, i32) {
    %c0_i32 = arith.constant 0 : i32
    return %arg0, %arg1 : i32, i32
  }
  func.func @transform_1(%arg0: i32, %arg1: i32) -> (i32, i32) {
    %c0_i32 = arith.constant 0 : i32
    %c0_i32_0 = arith.constant 0 : i32
    return %arg1, %c0_i32 : i32, i32
  }
  func.func @transform_2(%arg0: i32, %arg1: i32) -> (i32, i32) {
    %c0_i32 = arith.constant 0 : i32
    %c0_i32_0 = arith.constant 0 : i32
    %c0_i32_1 = arith.constant 0 : i32
    return %c0_i32, %c0_i32_0 : i32, i32
  }
  func.func @transform_3(%arg0: i32, %arg1: i32) -> (i32, i32) {
    %c0_i32 = arith.constant 0 : i32
    %c0_i32_0 = arith.constant 0 : i32
    return %arg0, %c0_i32 : i32, i32
  }
  func.func @transform_4(%arg0: i32, %arg1: i32) -> (i32, i32) {
    %c0_i32 = arith.constant 0 : i32
    %c0_i32_0 = arith.constant 0 : i32
    %c0_i32_1 = arith.constant 0 : i32
    return %c0_i32, %c0_i32_0 : i32, i32
  }
  func.func @transform_5(%arg0: i32, %arg1: i32) -> (i32, i32) {
    %c0_i32 = arith.constant 0 : i32
    %c0_i32_0 = arith.constant 0 : i32
    %c0_i32_1 = arith.constant 0 : i32
    return %c0_i32, %c0_i32_0 : i32, i32
  }
  func.func @transform_6(%arg0: i32, %arg1: i32) -> (i32, i32) {
    %c0_i32 = arith.constant 0 : i32
    %c0_i32_0 = arith.constant 0 : i32
    return %arg0, %c0_i32 : i32, i32
  }
}

</mosaic_0001>

<bundles_post_ra>
// kernel: encoder_block.5
= control target key start
LH: loop header
LB: loop body
LE: loop exit
PB: predicated region body
PF: predicated region fallthrough
CT: control target
= control target key end

     0   :  { %vm19_vm0 = vcmask 785408   ;;  %v145_v0 = vmov 0.0   ;;  %vm146_vm1 = vmmov 0   ;;  %vm43_vm2 = vcmask 261120   ;;  %s192_s1 = inlined_call_operand.vmem [shape: bf16[32,96], index: 1, kind: input, shape index: {}]   ;;  %s193_s0 = inlined_call_operand.vmem [shape: f32[16,32], index: 0, kind: input, shape index: {}]   ;;  %s194_s2 = inlined_call_operand.vmem [shape: f32[1,96], index: 2, kind: input, shape index: {}]   ;;  %s195_s3 = inlined_call_operand.vmem [shape: bf16[16,96], index: 3, kind: output, shape index: {}]  }
   0x1   :  { %133 = vmatprep.subr.bf16.mxu0 %v145_v0  ;;  %v143_v1 = vld [vmem:[%s192_s1 + $0x8] sm:$0xff]   ;;  %137 = vmatprep.mubr.msk.bf16.mxu0 %vm146_vm1, %v145_v0  ;;  %20 = vst.msk [vmem:[#allocation2] sm:$0xff] %vm19_vm0, %v145_v0  ;;  %21 = vst.msk [vmem:[#allocation2 + $0x8] sm:$0xff] %vm19_vm0, %v145_v0  ;;  %v144_v2 = vld [vmem:[%s192_s1] sm:$0xff]   ;;  %vm115_vm3 = vcmask 781312  }
   0x2   :  { %134 = vmatpush3.bf16.msra.mxu0 %v143_v1  ;;  %v24_v3 = vld [vmem:[%s193_s0] sm:$0xff]  ;;  %v25_v4 = vld [vmem:[%s193_s0 + $0x8] sm:$0xff] }
   0x3   :  { %135 = vmatprep.subr.bf16.mxu0 %v145_v0  ;;  %v26_v5 = vpack.c.bf16 %v25_v4, %v24_v3  ;;  %v125_v14 = vld [vmem:[%s194_s2] ss:$0 sm:$0xff] }
   0x6   :  { %136 = vmatpush3.bf16.msra.mxu0 %v144_v2 }
   0x8   :  { %v22_v6 = vld [vmem:[#allocation2] sm:$0xff]  ;;  %v23_v10 = vld [vmem:[#allocation2 + $0x8] sm:$0xff] }
   0x9   :  { %138 = vmatmul.mubr.msk.bf16.vlgmr.msra.gmra.mxu0 %vm43_vm2, %v26_v5 }
  0xc9   :  { %v81_v7 = vpop.f32.mrf.mxu0 }
  0xca   :  { %v88_v8 = vadd.f32 %v81_v7, %v22_v6 }
  0xcb   :  { %v139_v9 = vpop.f32.mrf.mxu0 }
  0xcc   :  { %91 = vst.msk [vmem:[#allocation2] sm:$0xff] %vm19_vm0, %v88_v8 }
  0xcd   :  { %v84_v11 = vpop.f32.mrf.mxu0 }
  0xce   :  { %v89_v12 = vadd.f32 %v84_v11, %v23_v10 }
  0xcf   :  { %v140_v13 = vpop.f32.mrf.mxu0 }
  0xd0   :  { %92 = vst.msk [vmem:[#allocation2 + $0x8] sm:$0xff] %vm19_vm0, %v89_v12 }
  0xd3   :  { %v96_v15 = vld [vmem:[#allocation2] sm:$0xff] }
  0xd4   :  { %v105_v16 = vadd.f32 %v125_v14, %v96_v15 }
  0xd6   :  { %v128_v17 = vpack.c.bf16 %v105_v16, %v105_v16 }
  0xd7   :  { %v97_v18 = vld [vmem:[#allocation2 + $0x8] sm:$0xff] }
  0xd8   :  { %116 = vst.msk [vmem:[%s195_s3] sm:$0xf] %vm115_vm3, %v128_v17  ;;  %v106_v19 = vadd.f32 %v125_v14, %v97_v18 }
  0xda   :  { %v129_v20 = vpack.c.bf16 %v106_v19, %v106_v19 }
  0xdc   :  { %117 = vst.msk [vmem:[%s195_s3 + $0x4] sm:$0xf] %vm115_vm3, %v129_v20 }

// kernel: encoder_block.6
= control target key start
LH: loop header
LB: loop body
LE: loop exit
PB: predicated region body
PF: predicated region fallthrough
CT: control target
= control target key end

     0   :  { %s807_s6 = smov 0   ;;  %s900_s0 = inlined_call_operand.vmem [shape: bf16[16,96], index: 0, kind: input, shape index: {}]   ;;  %s901_s1 = inlined_call_operand.vmem [shape: bf16[16,32], index: 1, kind: output, shape index: {}]  }
   0x1 LB: > { %s644_s7 = sadd.s32 4294967295, %s779_s6   ;;  %p648_p0 = scmp.ge.s32.totalorder %s779_s6, 1  ;;  %s779_s6 = sphi %s807_s6, %s11_s6  }
   0x2   : > { %p86_p1 = scmp.lt.s32.totalorder %s779_s6, 3 }
   0x4   : > { %p87_p2 = pnand %p648_p0, %p86_p1 }
   0x5   : > { %p104_p3 = scmp.lt.s32.totalorder (!%p87_p2), %s644_s7, 1  ;;  %s783_s12 = smov (!%p87_p2), 96  }
   0x6   : > { %90 = sbr.rel (%p87_p2) target bundleno = 1230 (0x4ce), region = 24  ;;  %s784_s13 = smov (!%p87_p2), 64  }
   0x7   : > { %s785_s14 = smov (!%p87_p2), 88   ;;  %s786_s15 = smov (!%p87_p2), 120  }
   0x8   : > { %s787_s16 = smov (!%p87_p2), 80   ;;  %s788_s17 = smov (!%p87_p2), 112  }
   0x9   : > { %s789_s18 = smov (!%p87_p2), 72   ;;  %s790_s19 = smov (!%p87_p2), 104  }
   0xa   : > { %s791_s20 = smov (!%p87_p2), 48   ;;  %s792_s21 = smov (!%p87_p2), 56  }
   0xb   : > { %v781_v0 = vmov 0.0   ;;  %vm782_vm0 = vmmov 0   ;;  %s903_s7 = smov (!%p104_p3, %s644_s7), 1  ;;  %vm119_vm1 = vcmask 64512   ;;  %vm182_vm2 = vcmask 1043456   ;;  %s793_s22 = smov 40  }
   0xc   : > { %684 = vmatprep.subr.bf16.mxu0 %v781_v0  ;;  %686 = vmatprep.mubr.msk.bf16.mxu0 %vm782_vm0, %v781_v0  ;;  %s649_s8 = sshll.u32 %s903_s7, 2  ;;  %s794_s23 = smov 8   ;;  %vm229_vm3 = vcmask 60416   ;;  %vm349_vm4 = vcmask 126016   ;;  %vm469_vm5 = vcmask 191616   ;;  %vm589_vm6 = vcmask 257216  }
   0xd   : > { %690 = vmatprep.subr.bf16.mxu1 %v781_v0  ;;  %692 = vmatprep.mubr.msk.bf16.mxu1 %vm782_vm0, %v781_v0  ;;  %s107_s11 = scalar_lea.vmem %s900_s0, %s649_s8  ;;  %s795_s24 = smov 16  }
   0xe   : > { %v113_v1 = vld [vmem:[%s107_s11] sm:$0xf]  ;;  %s111_s27 = scalar_lea.vmem %s901_s1, %s649_s8  ;;  %s796_s28 = smov 24  }
   0xf   : > { %v829_v2 = vcombine.low %v113_v1, %v113_v1 }
  0x11   : > { %117 = vrot.lane.b32.xlu0 %v829_v2, %s783_s12  ;;  %177 = vrot.lane.b32.xlu1 %v829_v2, %s784_s13 }
  0x15   : > { %233 = vrot.lane.b32.xlu1 %v829_v2, %s785_s14 }
  0x19   : > { %231 = vrot.lane.b32.xlu1 %v829_v2, %s786_s15 }
  0x1d   : > { %353 = vrot.lane.b32.xlu1 %v829_v2, %s787_s16 }
  0x21   : > { %351 = vrot.lane.b32.xlu1 %v829_v2, %s788_s17 }
  0x25   : > { %473 = vrot.lane.b32.xlu1 %v829_v2, %s789_s18 }
  0x29   : > { %471 = vrot.lane.b32.xlu1 %v829_v2, %s790_s19 }
  0x83   : > { %v118_v3 = vpop.permute.xlu0 %117  ;;  %v178_v11 = vpop.permute.xlu1 %177 }
  0x84   : > { %v124_v4 = vsel %vm119_vm1, %v118_v3, 0  ;;  %v184_v12 = vsel %vm182_vm2, %v178_v11, 0 }
  0x85   : > { %685 = vmatpush3.bf16.xpose.msra.mxu0 %v124_v4  ;;  %691 = vmatpush3.bf16.msra.mxu1 %v184_v12 }
  0x86   : > { %702 = vmatprep.subr.bf16.mxu0 %v781_v0  ;;  %696 = vmatprep.subr.bf16.mxu1 %v781_v0 }
  0x87   : > { %v234_v16 = vpop.permute.xlu1 %233 }
  0x88   : > { %v239_v19 = vsel %vm119_vm1, %v234_v16, 0 }
  0x8b   : > { %v232_v18 = vpop.permute.xlu1 %231 }
  0x8c   : > { %687 = vmatmul.mubr.msk.bf16.vlgmr.msra.gmra.mxu0 %vm119_vm1, %v113_v1 }
  0x8d   : > { %704 = vmatprep.mubr.msk.bf16.mxu0 %vm782_vm0, %v781_v0 }
  0x8f   : > { %v354_v21 = vpop.permute.xlu1 %353 }
  0x90   : > { %v359_v22 = vsel %vm119_vm1, %v354_v21, 0 }
  0x93   : > { %v352_v23 = vpop.permute.xlu1 %351 }
  0x97   : > { %v474_v24 = vpop.permute.xlu1 %473 }
  0x98   : > { %v479_v25 = vsel %vm119_vm1, %v474_v24, 0 }
  0x9b   : > { %v472_v26 = vpop.permute.xlu1 %471 }
 0x14c   : > { %v160_v5 = vpop.f32.mrf.mxu0 }
 0x14d   : > { %v166_v6 = vmul.f32 0.35355338, %v160_v5 }
 0x14e   : > { %v688_v7 = vpop.f32.mrf.mxu0 }
 0x14f   : > { %v167_v8 = vsel %vm119_vm1, %v166_v6, -inf }
 0x150   : > { %168 = vmax.xlane.f32.xlu0 %v167_v8  ;;  %v163_v9 = vpop.f32.mrf.mxu0 }
 0x152   : > { %v689_v10 = vpop.f32.mrf.mxu0 }
 0x1d9   : > { %v169_v13 = vpop.xlane.xlu0 %168 }
 0x1da   : > { %v170_v14 = vsub.f32 %v166_v6, %v169_v13 }
 0x1dc   : > { %v171_v15 = vmul.f32 1.442695, %v170_v14 }
 0x1de   : > { %757 = vpow2.f32 %v171_v15 }
 0x1eb   : > { %v847_v17 = vpop.eup %757 }
 0x1ec   : > { %v176_v20 = vpack.c.bf16 %v847_v17, %v847_v17  ;;  %v173_v10 = vsel %vm119_vm1, %v847_v17, 0.0 }
 0x1ee   : > { %693 = vmatmul.mubr.msk.bf16.vlgmr.msra.gmra.mxu1 %vm119_vm1, %v176_v20 }
 0x1ef   : > { %697 = vmatpush3.bf16.xpose.msra.mxu1 %v239_v19  ;;  %698 = vmatprep.mubr.msk.bf16.mxu1 %vm782_vm0, %v781_v0 }
 0x1f0   : > { %708 = vmatprep.subr.bf16.mxu1 %v781_v0 }
 0x1f6   : > { %699 = vmatmul.mubr.msk.bf16.vlgmr.msra.gmra.mxu1 %vm119_vm1, %v232_v18 }
 0x1f7   : > { %709 = vmatpush3.bf16.xpose.msra.mxu1 %v359_v22  ;;  %710 = vmatprep.mubr.msk.bf16.mxu1 %vm782_vm0, %v781_v0 }
 0x1f8   : > { %720 = vmatprep.subr.bf16.mxu1 %v781_v0 }
 0x1fe   : > { %711 = vmatmul.mubr.msk.bf16.vlgmr.msra.gmra.mxu1 %vm119_vm1, %v352_v23 }
 0x1ff   : > { %721 = vmatpush3.bf16.xpose.msra.mxu1 %v479_v25  ;;  %722 = vmatprep.mubr.msk.bf16.mxu1 %vm782_vm0, %v781_v0 }
 0x206   : > { %723 = vmatmul.mubr.msk.bf16.vlgmr.msra.gmra.mxu1 %vm119_vm1, %v472_v26 }
 0x2ae   : > { %v866_v27 = vpop.f32.mrf.mxu1 }
 0x2b0   : > { %v694_v28 = vpop.f32.mrf.mxu1 }
 0x2b2   : > { %v223_v29 = vpop.f32.mrf.mxu1 }
 0x2b4   : > { %v695_v30 = vpop.f32.mrf.mxu1 }
 0x2b6   : > { %v275_v31 = vpop.f32.mrf.mxu1 }
 0x2b7   : > { %v281_v32 = vmul.f32 0.35355338, %v275_v31 }
 0x2b8   : > { %v700_v33 = vpop.f32.mrf.mxu1 }
 0x2b9   : > { %v282_v34 = vsel %vm119_vm1, %v281_v32, -inf }
 0x2ba   : > { %283 = vmax.xlane.f32.xlu1 %v282_v34  ;;  %v278_v35 = vpop.f32.mrf.mxu1 }
 0x2bc   : > { %v701_v36 = vpop.f32.mrf.mxu1 }
 0x2be   : > { %v395_v37 = vpop.f32.mrf.mxu1 }
 0x2bf   : > { %v401_v38 = vmul.f32 0.35355338, %v395_v37 }
 0x2c0   : > { %v712_v39 = vpop.f32.mrf.mxu1 }
 0x2c1   : > { %v402_v40 = vsel %vm119_vm1, %v401_v38, -inf }
 0x2c2   : > { %403 = vmax.xlane.f32.xlu0 %v402_v40  ;;  %v398_v41 = vpop.f32.mrf.mxu1 }
 0x2c4   : > { %v713_v42 = vpop.f32.mrf.mxu1 }
 0x2c6   : > { %v515_v43 = vpop.f32.mrf.mxu1 }
 0x2c7   : > { %v521_v47 = vmul.f32 0.35355338, %v515_v43 }
 0x2c8   : > { %v724_v44 = vpop.f32.mrf.mxu1 }
 0x2c9   : > { %v522_v48 = vsel %vm119_vm1, %v521_v47, -inf }
 0x2ca   : > { %v518_v45 = vpop.f32.mrf.mxu1 }
 0x2cb   : > { %412 = vrot.lane.b32.xlu1 %v829_v2, %s791_s20 }
 0x2cc   : > { %v725_v46 = vpop.f32.mrf.mxu1 }
 0x2d8   : > { %292 = vrot.lane.b32.xlu0 %v829_v2, %s792_s21 }
 0x2f7   : > { %523 = vmax.xlane.f32.xlu0 %v522_v48 }
 0x30d   : > { %532 = vrot.lane.b32.xlu0 %v829_v2, %s793_s22 }
 0x343   : > { %v284_v49 = vpop.xlane.xlu1 %283 }
 0x344   : > { %v285_v50 = vsub.f32 %v281_v32, %v284_v49 }
 0x346   : > { %v286_v51 = vmul.f32 1.442695, %v285_v50 }
 0x347   : > { %v413_v57 = vpop.permute.xlu1 %412 }
 0x348   : > { %759 = vpow2.f32 %v286_v51  ;;  %v418_v61 = vsel %vm182_vm2, %v413_v57, 0 }
 0x34b   : > { %v404_v52 = vpop.xlane.xlu0 %403 }
 0x34c   : > { %v405_v53 = vsub.f32 %v401_v38, %v404_v52 }
 0x34e   : > { %v406_v54 = vmul.f32 1.442695, %v405_v53 }
 0x34f   : > { %v293_v55 = vpop.permute.xlu0 %292 }
 0x350   : > { %761 = vpow2.f32 %v406_v54  ;;  %v298_v56 = vsel %vm182_vm2, %v293_v55, 0 }
 0x351   : > { %703 = vmatpush3.bf16.msra.mxu0 %v298_v56 }
 0x352   : > { %714 = vmatprep.subr.bf16.mxu0 %v781_v0 }
 0x355   : > { %v760_v58 = vpop.eup %759 }
 0x356   : > { %v288_v59 = vsel %vm119_vm1, %v760_v58, 0.0  ;;  %v291_v60 = vpack.c.bf16 %v760_v58, %v760_v58 }
 0x357   : > { %289 = vadd.xlane.f32.xlu0 %v288_v59 }
 0x358   : > { %705 = vmatmul.mubr.msk.bf16.vlgmr.msra.gmra.mxu0 %vm119_vm1, %v291_v60 }
 0x359   : > { %715 = vmatpush3.bf16.msra.mxu0 %v418_v61  ;;  %716 = vmatprep.mubr.msk.bf16.mxu0 %vm782_vm0, %v781_v0 }
 0x35a   : > { %726 = vmatprep.subr.bf16.mxu0 %v781_v0 }
 0x35d   : > { %v762_v62 = vpop.eup %761 }
 0x35e   : > { %v408_v63 = vsel %vm119_vm1, %v762_v62, 0.0  ;;  %v411_v1 = vpack.c.bf16 %v762_v62, %v762_v62 }
 0x35f   : > { %409 = vadd.xlane.f32.xlu1 %v408_v63 }
 0x360   : > { %717 = vmatmul.mubr.msk.bf16.vlgmr.msra.gmra.mxu0 %vm119_vm1, %v411_v1 }
 0x361   : > { %728 = vmatprep.mubr.msk.bf16.mxu0 %vm782_vm0, %v781_v0 }
 0x380   : > { %v524_v2 = vpop.xlane.xlu0 %523 }
 0x381   : > { %v525_v3 = vsub.f32 %v521_v47, %v524_v2 }
 0x383   : > { %v526_v4 = vmul.f32 1.442695, %v525_v3 }
 0x384   : > { %v533_v5 = vpop.permute.xlu0 %532 }
 0x385   : > { %763 = vpow2.f32 %v526_v4  ;;  %v538_v6 = vsel %vm182_vm2, %v533_v5, 0 }
 0x386   : > { %727 = vmatpush3.bf16.msra.mxu0 %v538_v6 }
 0x392   : > { %v764_v7 = vpop.eup %763 }
 0x393   : > { %v528_v8 = vsel %vm119_vm1, %v764_v7, 0.0  ;;  %v531_v9 = vpack.c.bf16 %v764_v7, %v764_v7 }
 0x394   : > { %529 = vadd.xlane.f32.xlu0 %v528_v8 }
 0x395   : > { %729 = vmatmul.mubr.msk.bf16.vlgmr.msra.gmra.mxu0 %vm119_vm1, %v531_v9 }
 0x398   : > { %174 = vadd.xlane.f32.xlu0 %v173_v10 }
 0x3e0   : > { %v290_v0 = vpop.xlane.xlu0 %289 }
 0x3e1   : > { %765 = vrcp.f32 %v290_v0 }
 0x3e8   : > { %v410_v11 = vpop.xlane.xlu1 %409 }
 0x3e9   : > { %767 = vrcp.f32 %v410_v11 }
 0x3ee   : > { %v766_v12 = vpop.eup %765 }
 0x3f6   : > { %v768_v21 = vpop.eup %767 }
 0x418   : > { %v334_v13 = vpop.f32.mrf.mxu0 }
 0x419   : > { %v341_v14 = vmul.f32 %v766_v12, %v334_v13 }
 0x41a   : > { %v706_v15 = vpop.f32.mrf.mxu0 }
 0x41b   : > { %v665_v16 = vpack.c.bf16 %v341_v14, %v341_v14 }
 0x41c   : > { %v337_v18 = vpop.f32.mrf.mxu0 }
 0x41d   : > { %v530_v19 = vpop.xlane.xlu0 %529  ;;  %346 = vrot.lane.b32.xlu0 %v665_v16, %s794_s23 }
 0x41e   : > { %v707_v20 = vpop.f32.mrf.mxu0 }
 0x420   : > { %v454_v22 = vpop.f32.mrf.mxu0 }
 0x421   : > { %v461_v23 = vmul.f32 %v768_v21, %v454_v22  ;;  %v175_v17 = vpop.xlane.xlu0 %174 }
 0x422   : > { %769 = vrcp.f32 %v175_v17  ;;  %v718_v24 = vpop.f32.mrf.mxu0 }
 0x423   : > { %v666_v25 = vpack.c.bf16 %v461_v23, %v461_v23  ;;  %771 = vrcp.f32 %v530_v19 }
 0x424   : > { %v457_v26 = vpop.f32.mrf.mxu0 }
 0x425   : > { %466 = vrot.lane.b32.xlu1 %v666_v25, %s795_s24 }
 0x426   : > { %v719_v28 = vpop.f32.mrf.mxu0 }
 0x42f   : > { %v770_v29 = vpop.eup %769 }
 0x430   : > { %v227_v30 = vmul.f32 %v770_v29, %v866_v27  ;;  %v772_v32 = vpop.eup %771 }
 0x432   : > { %v228_v31 = vpack.c.bf16 %v227_v30, %v227_v30 }
 0x434   : > { %230 = vst.msk [vmem:[%s111_s27] sm:$0xf] %vm229_vm3, %v228_v31 }
 0x455   : > { %v574_v33 = vpop.f32.mrf.mxu0 }
 0x456   : > { %v581_v34 = vmul.f32 %v772_v32, %v574_v33 }
 0x457   : > { %v730_v35 = vpop.f32.mrf.mxu0 }
 0x458   : > { %v667_v36 = vpack.c.bf16 %v581_v34, %v581_v34 }
 0x459   : > { %v577_v37 = vpop.f32.mrf.mxu0 }
 0x45a   : > { %586 = vrot.lane.b32.xlu0 %v667_v36, %s796_s28 }
 0x45b   : > { %v731_v38 = vpop.f32.mrf.mxu0 }
 0x48f   : > { %v347_v27 = vpop.permute.xlu0 %346 }
 0x490   : > { %350 = vst.msk [vmem:[%s111_s27] sm:$0xf] %vm349_vm4, %v347_v27 }
 0x497   : > { %v467_v39 = vpop.permute.xlu1 %466 }
 0x498   : > { %470 = vst.msk [vmem:[%s111_s27] sm:$0xf] %vm469_vm5, %v467_v39 }
 0x4cc   : > { %v587_v40 = vpop.permute.xlu0 %586 }
 0x4cd   : > { %590 = vst.msk [vmem:[%s111_s27] sm:$0xf] %vm589_vm6, %v587_v40 }
 0x4ce PF: > { %s11_s6 = sadd.s32 1, %s779_s6  }
 0x4cf   : > { %p8_p4 = scmp.ge.s32.totalorder %s11_s6, 4  }
 0x4d1   :  { %10 = sbr.rel (!%p8_p4) target bundleno = 1 (0x1), region = 54 }

// kernel: encoder_block.8
= control target key start
LH: loop header
LB: loop body
LE: loop exit
PB: predicated region body
PF: predicated region fallthrough
CT: control target
= control target key end

     0   :  { %vm19_vm0 = vcmask 523264   ;;  %v147_v0 = vmov 0.0   ;;  %vm148_vm1 = vmmov 0   ;;  %vm43_vm2 = vcmask 261120   ;;  %s194_s1 = inlined_call_operand.vmem [shape: bf16[32,64], index: 1, kind: input, shape index: {}]   ;;  %s195_s0 = inlined_call_operand.vmem [shape: f32[16,32], index: 0, kind: input, shape index: {}]   ;;  %s196_s2 = inlined_call_operand.vmem [shape: f32[1,64], index: 2, kind: input, shape index: {}]   ;;  %s197_s3 = inlined_call_operand.vmem [shape: bf16[16,64], index: 3, kind: output, shape index: {}]  }
   0x1   :  { %135 = vmatprep.subr.bf16.mxu0 %v147_v0  ;;  %v145_v1 = vld [vmem:[%s194_s1 + $0x8] sm:$0xff]   ;;  %139 = vmatprep.mubr.msk.bf16.mxu0 %vm148_vm1, %v147_v0  ;;  %20 = vst.msk [vmem:[#allocation2] sm:$0xff] %vm19_vm0, %v147_v0  ;;  %21 = vst.msk [vmem:[#allocation2 + $0x8] sm:$0xff] %vm19_vm0, %v147_v0  ;;  %v146_v2 = vld [vmem:[%s194_s1] sm:$0xff]   ;;  %vm117_vm3 = vcmask 519168  }
   0x2   :  { %136 = vmatpush3.bf16.msra.mxu0 %v145_v1  ;;  %v24_v3 = vld [vmem:[%s195_s0] sm:$0xff]  ;;  %v25_v4 = vld [vmem:[%s195_s0 + $0x8] sm:$0xff] }
   0x3   :  { %137 = vmatprep.subr.bf16.mxu0 %v147_v0  ;;  %v26_v5 = vpack.c.bf16 %v25_v4, %v24_v3  ;;  %v127_v14 = vld [vmem:[%s196_s2] ss:$0 sm:$0xff] }
   0x6   :  { %138 = vmatpush3.bf16.msra.mxu0 %v146_v2 }
   0x8   :  { %v22_v6 = vld [vmem:[#allocation2] sm:$0xff]  ;;  %v23_v10 = vld [vmem:[#allocation2 + $0x8] sm:$0xff] }
   0x9   :  { %140 = vmatmul.mubr.msk.bf16.vlgmr.msra.gmra.mxu0 %vm43_vm2, %v26_v5 }
  0xc9   :  { %v81_v7 = vpop.f32.mrf.mxu0 }
  0xca   :  { %v88_v8 = vadd.f32 %v81_v7, %v22_v6 }
  0xcb   :  { %v141_v9 = vpop.f32.mrf.mxu0 }
  0xcc   :  { %91 = vst.msk [vmem:[#allocation2] sm:$0xff] %vm19_vm0, %v88_v8 }
  0xcd   :  { %v84_v11 = vpop.f32.mrf.mxu0 }
  0xce   :  { %v89_v12 = vadd.f32 %v84_v11, %v23_v10 }
  0xcf   :  { %v142_v13 = vpop.f32.mrf.mxu0 }
  0xd0   :  { %92 = vst.msk [vmem:[#allocation2 + $0x8] sm:$0xff] %vm19_vm0, %v89_v12 }
  0xd3   :  { %v96_v15 = vld [vmem:[#allocation2] sm:$0xff] }
  0xd4   :  { %v105_v16 = vadd.f32 %v127_v14, %v96_v15 }
  0xd6   :  { %v107_v17 = vmax.f32 %v105_v16, 0.0 }
  0xd7   :  { %v97_v18 = vld [vmem:[#allocation2 + $0x8] sm:$0xff] }
  0xd8   :  { %v130_v19 = vpack.c.bf16 %v107_v17, %v107_v17  ;;  %v106_v20 = vadd.f32 %v127_v14, %v97_v18 }
  0xda   :  { %118 = vst.msk [vmem:[%s197_s3] sm:$0xf] %vm117_vm3, %v130_v19  ;;  %v108_v21 = vmax.f32 %v106_v20, 0.0 }
  0xdc   :  { %v131_v22 = vpack.c.bf16 %v108_v21, %v108_v21 }
  0xde   :  { %119 = vst.msk [vmem:[%s197_s3 + $0x4] sm:$0xf] %vm117_vm3, %v131_v22 }

// kernel: encoder_block.7
= control target key start
LH: loop header
LB: loop body
LE: loop exit
PB: predicated region body
PF: predicated region fallthrough
CT: control target
= control target key end

     0   :  { %vm28_vm0 = vcmask 261120   ;;  %v200_v0 = vmov 0.0   ;;  %vm201_vm1 = vmmov 0   ;;  %s278_s1 = inlined_call_operand.vmem [shape: bf16[32,32], index: 1, kind: input, shape index: {}]   ;;  %s279_s0 = inlined_call_operand.vmem [shape: bf16[16,32], index: 0, kind: input, shape index: {}]   ;;  %s280_s2 = inlined_call_operand.vmem [shape: f32[1,32], index: 2, kind: input, shape index: {}]   ;;  %s281_s3 = inlined_call_operand.vmem [shape: f32[16,32], index: 3, kind: input, shape index: {}]   ;;  %s282_s4 = inlined_call_operand.vmem [shape: f32[1,32], index: 4, kind: input, shape index: {}]   ;;  %s283_s5 = inlined_call_operand.vmem [shape: f32[1,32], index: 5, kind: input, shape index: {}]   ;;  %s284_s6 = inlined_call_operand.vmem [shape: f32[16,32], index: 6, kind: output, shape index: {}]  }
   0x1   :  { %183 = vmatprep.subr.bf16.mxu0 %v200_v0  ;;  %v193_v1 = vld [vmem:[%s278_s1 + $0x8] sm:$0xff]   ;;  %187 = vmatprep.mubr.msk.bf16.mxu0 %vm201_vm1, %v200_v0  ;;  %29 = vst.msk [vmem:[#allocation2] sm:$0xff] %vm28_vm0, %v200_v0  ;;  %30 = vst.msk [vmem:[#allocation2 + $0x8] sm:$0xff] %vm28_vm0, %v200_v0  ;;  %v194_v2 = vld [vmem:[%s278_s1] sm:$0xff]  }
   0x2   :  { %184 = vmatpush3.bf16.msra.mxu0 %v193_v1  ;;  %v195_v3 = vld [vmem:[%s279_s0] sm:$0xff]   ;;  %v120_v18 = vld [vmem:[%s281_s3 + $0x8] sm:$0xff] }
   0x3   :  { %185 = vmatprep.subr.bf16.mxu0 %v200_v0  ;;  %v177_v12 = vld [vmem:[%s280_s2] ss:$0 sm:$0xff] }
   0x4   :  { %v119_v14 = vld [vmem:[%s281_s3] sm:$0xff] }
   0x5   :  { %v178_v40 = vld [vmem:[%s282_s4] ss:$0 sm:$0xff] }
   0x6   :  { %186 = vmatpush3.bf16.msra.mxu0 %v194_v2  ;;  %v179_v42 = vld [vmem:[%s283_s5] ss:$0 sm:$0xff] }
   0x8   :  { %v31_v4 = vld [vmem:[#allocation2] sm:$0xff]  ;;  %v32_v8 = vld [vmem:[#allocation2 + $0x8] sm:$0xff] }
   0x9   :  { %188 = vmatmul.mubr.msk.bf16.vlgmr.msra.gmra.mxu0 %vm28_vm0, %v195_v3 }
  0xc9   :  { %v94_v5 = vpop.f32.mrf.mxu0 }
  0xca   :  { %v101_v6 = vadd.f32 %v94_v5, %v31_v4 }
  0xcb   :  { %v189_v7 = vpop.f32.mrf.mxu0 }
  0xcc   :  { %103 = vst.msk [vmem:[#allocation2] sm:$0xff] %vm28_vm0, %v101_v6 }
  0xcd   :  { %v97_v9 = vpop.f32.mrf.mxu0 }
  0xce   :  { %v102_v10 = vadd.f32 %v97_v9, %v32_v8 }
  0xcf   :  { %v190_v11 = vpop.f32.mrf.mxu0 }
  0xd0   :  { %104 = vst.msk [vmem:[#allocation2 + $0x8] sm:$0xff] %vm28_vm0, %v102_v10 }
  0xd3   :  { %v108_v13 = vld [vmem:[#allocation2] sm:$0xff] }
  0xd4   :  { %v117_v15 = vadd.f32 %v177_v12, %v108_v13 }
  0xd6   :  { %v121_v16 = vadd.f32 %v119_v14, %v117_v15 }
  0xd7   :  { %v109_v17 = vld [vmem:[#allocation2 + $0x8] sm:$0xff] }
  0xd8   :  { %v123_v19 = vsel %vm28_vm0, %v121_v16, 0.0  ;;  %v118_v20 = vadd.f32 %v177_v12, %v109_v17 }
  0xd9   :  { %124 = vadd.xlane.f32.xlu0 %v123_v19 }
  0xda   :  { %v122_v21 = vadd.f32 %v120_v18, %v118_v20 }
  0xdc   :  { %v126_v22 = vsel %vm28_vm0, %v122_v21, 0.0 }
  0xdd   :  { %127 = vadd.xlane.f32.xlu0 %v126_v22 }
 0x162   :  { %v125_v23 = vpop.xlane.xlu0 %124 }
 0x163   :  { %v129_v24 = vmul.f32 0.03125, %v125_v23 }
 0x165   :  { %v131_v25 = vsub.f32 %v121_v16, %v129_v24 }
 0x166   :  { %v128_v26 = vpop.xlane.xlu0 %127 }
 0x167   :  { %v130_v27 = vmul.f32 0.03125, %v128_v26  ;;  %v133_v28 = vmul.f32 %v131_v25, %v131_v25 }
 0x169   :  { %v132_v29 = vsub.f32 %v122_v21, %v130_v27  ;;  %v135_v30 = vsel %vm28_vm0, %v133_v28, 0.0 }
 0x16a   :  { %136 = vadd.xlane.f32.xlu1 %v135_v30 }
 0x16b   :  { %v134_v31 = vmul.f32 %v132_v29, %v132_v29 }
 0x16d   :  { %v138_v32 = vsel %vm28_vm0, %v134_v31, 0.0 }
 0x16e   :  { %139 = vadd.xlane.f32.xlu1 %v138_v32 }
 0x1f3   :  { %v137_v33 = vpop.xlane.xlu1 %136 }
 0x1f4   :  { %v141_v34 = vmul.f32 0.032258064, %v137_v33 }
 0x1f6   :  { %v143_v35 = vadd.f32 1e-12, %v141_v34 }
 0x1f7   :  { %v140_v36 = vpop.xlane.xlu1 %139 }
 0x1f8   :  { %196 = vrsqrt.f32 %v143_v35  ;;  %v142_v37 = vmul.f32 0.032258064, %v140_v36 }
 0x1fa   :  { %v144_v38 = vadd.f32 1e-12, %v142_v37 }
 0x1fc   :  { %198 = vrsqrt.f32 %v144_v38 }
 0x205   :  { %v197_v39 = vpop.eup %196 }
 0x206   :  { %v147_v41 = vmul.f32 %v197_v39, %v131_v25 }
 0x208   :  { %v156_v43 = vmul.f32 %v178_v40, %v147_v41 }
 0x209   :  { %v199_v44 = vpop.eup %198 }
 0x20a   :  { %v165_v45 = vadd.f32 %v179_v42, %v156_v43  ;;  %v148_v46 = vmul.f32 %v199_v44, %v132_v29 }
 0x20c   :  { %167 = vst.msk [vmem:[%s284_s6] sm:$0xff] %vm28_vm0, %v165_v45  ;;  %v157_v47 = vmul.f32 %v178_v40, %v148_v46 }
 0x20e   :  { %v166_v48 = vadd.f32 %v179_v42, %v157_v47 }
 0x210   :  { %168 = vst.msk [vmem:[%s284_s6 + $0x8] sm:$0xff] %vm28_vm0, %v166_v48 }

// kernel: encoder_block.9
= control target key start
LH: loop header
LB: loop body
LE: loop exit
PB: predicated region body
PF: predicated region fallthrough
CT: control target
= control target key end

     0   :  { %v265_v1 = vmov 0.0   ;;  %vm266_vm0 = vmmov 0   ;;  %vm29_vm1 = vcmask 261120   ;;  %s348_s0 = inlined_call_operand.vmem [shape: bf16[16,64], index: 0, kind: input, shape index: {}]   ;;  %s349_s1 = inlined_call_operand.vmem [shape: bf16[64,32], index: 1, kind: input, shape index: {}]   ;;  %s350_s2 = inlined_call_operand.vmem [shape: f32[1,32], index: 2, kind: input, shape index: {}]   ;;  %s351_s3 = inlined_call_operand.vmem [shape: f32[16,32], index: 3, kind: input, shape index: {}]   ;;  %s352_s4 = inlined_call_operand.vmem [shape: f32[1,32], index: 4, kind: input, shape index: {}]   ;;  %s353_s5 = inlined_call_operand.vmem [shape: f32[1,32], index: 5, kind: input, shape index: {}]   ;;  %s354_s6 = inlined_call_operand.hbm [shape: f32[16,32], index: 6, kind: output, shape index: {}]  }
   0x1   :  { %v234_v0 = vld [vmem:[%s349_s1 + $0x18] sm:$0xff]   ;;  %217 = vmatprep.subr.bf16.mxu0 %v265_v1  ;;  %v235_v2 = vld [vmem:[%s349_s1 + $0x10] sm:$0xff]   ;;  %225 = vmatprep.mubr.msk.bf16.mxu0 %vm266_vm0, %v265_v1  ;;  %30 = vst.msk [vmem:[#allocation2] sm:$0xff] %vm29_vm1, %v265_v1  ;;  %31 = vst.msk [vmem:[#allocation2 + $0x8] sm:$0xff] %vm29_vm1, %v265_v1 }
   0x2   :  { %218 = vmatpush3.bf16.msra.mxu0 %v234_v0 }
   0x3   :  { %219 = vmatprep.subr.bf16.mxu0 %v265_v1 }
   0x4   :  { %11 = vsyncpa [#allocation4], 0  ;;  %v236_v3 = vld [vmem:[%s349_s1 + $0x8] sm:$0xff]   ;;  %v237_v4 = vld [vmem:[%s349_s1] sm:$0xff]   ;;  %vm73_vm2 = vcmask 523264   ;;  %s267_s13 = smov [#allocation3]  }
   0x5   :  { %v238_v5 = vld [vmem:[%s348_s0] sm:$0xff]   ;;  %v138_v20 = vld [vmem:[%s351_s3 + $0x8] sm:$0xff]  ;;  %s192_s14 = sshll.u32 %s267_s13, 4  ;;  %s193_s14 = int_to_ptr.vmem [resolvable:$true] %s192_s14 }
   0x6   :  { %220 = vmatpush3.bf16.msra.mxu0 %v235_v2  ;;  %v209_v14 = vld [vmem:[%s350_s2] ss:$0 sm:$0xff]  ;;  %s243_s15 = scalar_lea.vmem %s193_s14, 256  ;;  %p248_p1 = scmp.lt.s32.totalorder %s193_s14, %s193_s14 }
   0x7   :  { %221 = vmatprep.subr.bf16.mxu0 %v265_v1  ;;  %v137_v16 = vld [vmem:[%s351_s3] sm:$0xff]  ;;  %p244_p0 = scmp.ne.s32.totalorder %s193_s14, %s243_s15  ;;  %p249_p2 = scmp.lt.s32.totalorder %s243_s15, %s243_s15 }
   0x8   :  { %v32_v6 = vld [vmem:[#allocation2] sm:$0xff]  ;;  %v33_v10 = vld [vmem:[#allocation2 + $0x8] sm:$0xff] }
   0x9   :  { %v210_v42 = vld [vmem:[%s352_s4] ss:$0 sm:$0xff]  ;;  %p250_p3 = por %p249_p2, %p248_p1 }
   0xa   :  { %222 = vmatpush3.bf16.msra.mxu0 %v236_v3  ;;  %v211_v44 = vld [vmem:[%s353_s5] ss:$0 sm:$0xff] }
   0xb   :  { %223 = vmatprep.subr.bf16.mxu0 %v265_v1  ;;  %p251_p4 = pnand %p250_p3, %p244_p0 }
   0xe   :  { %224 = vmatpush3.bf16.msra.mxu0 %v237_v4 }
  0x11   :  { %226 = vmatmul.mubr.msk.bf16.vlgmr.msra.gmra.mxu0 %vm73_vm2, %v238_v5 }
  0xd1   :  { %v111_v7 = vpop.f32.mrf.mxu0 }
  0xd2   :  { %v118_v8 = vadd.f32 %v111_v7, %v32_v6 }
  0xd3   :  { %v227_v9 = vpop.f32.mrf.mxu0 }
  0xd4   :  { %121 = vst.msk [vmem:[#allocation2] sm:$0xff] %vm29_vm1, %v118_v8 }
  0xd5   :  { %v114_v11 = vpop.f32.mrf.mxu0 }
  0xd6   :  { %v119_v12 = vadd.f32 %v114_v11, %v33_v10 }
  0xd7   :  { %v228_v13 = vpop.f32.mrf.mxu0 }
  0xd8   :  { %122 = vst.msk [vmem:[#allocation2 + $0x8] sm:$0xff] %vm29_vm1, %v119_v12 }
  0xdb   :  { %v126_v15 = vld [vmem:[#allocation2] sm:$0xff] }
  0xdc   :  { %v135_v17 = vadd.f32 %v209_v14, %v126_v15 }
  0xde   :  { %v139_v18 = vadd.f32 %v137_v16, %v135_v17 }
  0xdf   :  { %v127_v19 = vld [vmem:[#allocation2 + $0x8] sm:$0xff] }
  0xe0   :  { %v141_v21 = vsel %vm29_vm1, %v139_v18, 0.0  ;;  %v136_v22 = vadd.f32 %v209_v14, %v127_v19 }
  0xe1   :  { %142 = vadd.xlane.f32.xlu0 %v141_v21 }
  0xe2   :  { %v140_v23 = vadd.f32 %v138_v20, %v136_v22 }
  0xe4   :  { %v144_v24 = vsel %vm29_vm1, %v140_v23, 0.0 }
  0xe5   :  { %145 = vadd.xlane.f32.xlu0 %v144_v24 }
 0x16a   :  { %v143_v25 = vpop.xlane.xlu0 %142 }
 0x16b   :  { %v147_v26 = vmul.f32 0.03125, %v143_v25 }
 0x16d   :  { %v149_v27 = vsub.f32 %v139_v18, %v147_v26 }
 0x16e   :  { %v146_v28 = vpop.xlane.xlu0 %145 }
 0x16f   :  { %v148_v29 = vmul.f32 0.03125, %v146_v28  ;;  %v151_v30 = vmul.f32 %v149_v27, %v149_v27 }
 0x171   :  { %v150_v31 = vsub.f32 %v140_v23, %v148_v29  ;;  %v153_v32 = vsel %vm29_vm1, %v151_v30, 0.0 }
 0x172   :  { %154 = vadd.xlane.f32.xlu1 %v153_v32 }
 0x173   :  { %v152_v33 = vmul.f32 %v150_v31, %v150_v31 }
 0x175   :  { %v156_v34 = vsel %vm29_vm1, %v152_v33, 0.0 }
 0x176   :  { %157 = vadd.xlane.f32.xlu1 %v156_v34 }
 0x1fb   :  { %v155_v35 = vpop.xlane.xlu1 %154 }
 0x1fc   :  { %v159_v36 = vmul.f32 0.032258064, %v155_v35 }
 0x1fe   :  { %v161_v37 = vadd.f32 1e-12, %v159_v36 }
 0x1ff   :  { %v158_v38 = vpop.xlane.xlu1 %157 }
 0x200   :  { %239 = vrsqrt.f32 %v161_v37  ;;  %v160_v39 = vmul.f32 0.032258064, %v158_v38 }
 0x202   :  { %v162_v40 = vadd.f32 1e-12, %v160_v39 }
 0x204   :  { %241 = vrsqrt.f32 %v162_v40 }
 0x20d   :  { %v240_v41 = vpop.eup %239 }
 0x20e   :  { %v165_v43 = vmul.f32 %v240_v41, %v149_v27 }
 0x210   :  { %v174_v45 = vmul.f32 %v210_v42, %v165_v43 }
 0x211   :  { %v242_v46 = vpop.eup %241 }
 0x212   :  { %v166_v47 = vmul.f32 %v242_v46, %v150_v31  ;;  %v183_v48 = vadd.f32 %v211_v44, %v174_v45 }
 0x214   :  { %v175_v49 = vmul.f32 %v210_v42, %v166_v47  ;;  %185 = vst.msk [vmem:[#allocation3] sm:$0xff] %vm29_vm1, %v183_v48 }
 0x216   :  { %v184_v50 = vadd.f32 %v211_v44, %v175_v49 }
 0x218   :  { %186 = vst.msk [vmem:[#allocation3 + $0x8] sm:$0xff] %vm29_vm1, %v184_v50 }
 0x219   :  { %254 = shalt.err (!%p251_p4)
}
 0x21a   :  { %s268_s4 = smov 128   ;;  %s269_s5 = smov 8  }
 0x21b   :  { %198 = dma.vmem_to_hbm [thread:$0]  %s193_s14, 256, %s354_s6, [#allocation4], %s268_s4, %s268_s4, %s269_s5  }
 0x21c   :  { %263 = dma.done.wait [#allocation4], 256  }
 0x21d   :  { %264 = vsyncadd [#allocation4], 4294967040 }
 0x21e   :  { %202 = vsyncpa [#allocation4], 1 }

</bundles_post_ra>
